<compile_context>
chip_gen: v7x
topology: tpu7x:2x2x1
jax: 0.10.0
libtpu: 0.0.40
codegen_flags: <defaults>
</compile_context>

<pallas_src>
import functools

import jax
import jax.numpy as jnp
from jax import lax
from jax.experimental import pallas as pl
from jax.experimental.pallas import tpu as pltpu


# --------------------------------------------------------------------------
# Kernel
# --------------------------------------------------------------------------
def _block_kernel(x_ref, w_ref, bias_ref, gamma_ref, beta_ref, gw_ref, gwt_ref,
                  *rest, groups, rows_out, wt, eps, has_scale_shift):
    # x_ref:    (nb, (H+2)*Wt, (r+2)*C_in)  padded NHWC row slab (bf16/f32)
    # w_ref:    (3, (r+2)*C_in, r*C_out)    kw-banded conv weights, one per kh
    # bias_ref / gamma_ref / beta_ref: (1, r*C_out)   per-lane (tiled over r)
    # gw_ref:   (r*C_out, groups)           one-hot lane->group matrix
    # gwt_ref:  (groups, r*C_out)           group->lane broadcast matrix
    # [scale_ref, shift_ref]: (nb, r*C_out) optional per-sample affine
    # o_ref:    (nb, H*Wt, r*C_out)         lane-dense output slab
    if has_scale_shift:
        scale_ref, shift_ref, o_ref = rest
    else:
        (o_ref,) = rest
        scale_ref = shift_ref = None

    nb, _, lc = o_ref.shape

    # ---- 3x3 conv: three row-shifted MXU matmuls against the kh bands ------
    x_all = x_ref[...]                                    # (nb, rows_in, K)

    def band_matmul(kh):
        xs = x_all[:, kh * wt:kh * wt + rows_out, :]      # (nb, rows_out, K)
        if rows_out % 8 == 0:
            out2d = jnp.dot(xs.reshape(nb * rows_out, -1), w_ref[kh],
                            preferred_element_type=jnp.float32)
            return out2d.reshape(nb, rows_out, lc)
        # TODO(synk): unaligned rows_out -> per-sample matmuls (the reshape
        # above would force a sublane relayout); pad H in the wrapper for
        # large unaligned shapes instead.
        return jnp.stack(
            [jnp.dot(xs[b], w_ref[kh], preferred_element_type=jnp.float32)
             for b in range(nb)], axis=0)

    acc = band_matmul(0) + band_matmul(1) + band_matmul(2)   # (nb, rows, LC) f32

    # ---- GroupNorm statistics (conv bias folded analytically, no full add) --
    bias = bias_ref[...]                                  # (1, LC)
    nrows = jnp.float32(rows_out)
    s1 = jnp.sum(acc, axis=1)                             # (nb, LC)
    s2 = jnp.sum(acc * acc, axis=1)                       # (nb, LC)
    s2 = s2 + 2.0 * bias * s1 + nrows * bias * bias       # stats of (acc + bias)
    s1 = s1 + nrows * bias
    # TODO(synk): E[x^2]-E[x]^2 can cancel for large-mean activations; switch
    # to a shifted two-pass form if this Block sees un-normalized UNet inputs.

    cnt = nrows * jnp.float32(lc // groups)               # = H*W*cpg per group
    s12 = jnp.concatenate([s1, s2], axis=0)               # (2nb, LC)
    g12 = jnp.dot(s12, gw_ref[...],
                  preferred_element_type=jnp.float32) / cnt   # (2nb, G)
    mean_g = g12[:nb]
    var_g = g12[nb:] - mean_g * mean_g                    # biased (torch GN)
    inv_g = lax.rsqrt(var_g + eps)
    mi = jnp.concatenate([mean_g, inv_g], axis=0)         # (2nb, G)
    mi_c = jnp.dot(mi, gwt_ref[...],
                   preferred_element_type=jnp.float32)    # (2nb, LC)
    mean_c = mi_c[:nb]
    inv_c = mi_c[nb:]

    # ---- fold GroupNorm affine + conv bias (+ optional scale/shift): one FMA
    a = inv_c * gamma_ref[...]                            # (nb, LC)
    b = beta_ref[...] + (bias - mean_c) * a
    if has_scale_shift:
        sp1 = scale_ref[...] + 1.0
        a = a * sp1
        b = b * sp1 + shift_ref[...]
    y = acc * a[:, None, :] + b[:, None, :]
    o_ref[...] = (y * jax.nn.sigmoid(y)).astype(o_ref.dtype)     # SiLU


# --------------------------------------------------------------------------
# Wrapper helpers
# --------------------------------------------------------------------------
def _vmem_capacity_bytes():
    try:
        return int(pltpu.get_tpu_info().vmem_capacity_bytes)
    except Exception:
        return 64 * 1024 * 1024          # conservative (v7x-sized) fallback


def _device_kind():
    try:
        return jax.devices()[0].device_kind.lower()
    except Exception:
        return ""


def _num_tensorcores():
    kind = _device_kind()
    # Generations exposing 2 TensorCores behind one device (megacore / v7x).
    return 2 if any(t in kind for t in ("v4", "v5p", "v7", "7x")) else 1


def _pick_wfold(w, c_out, lane_target):
    """Smallest divisor r of W with r*C_out >= lane_target (lane-dense out)."""
    r_min = max(1, -(-lane_target // c_out))
    for d in range(1, w + 1):
        if w % d == 0 and d >= r_min:
            return d
    return w


def _pick_batch_tile(n, per_sample_bytes, budget_bytes, num_tc):
    divisors = [d for d in range(1, n + 1) if n % d == 0]
    fits = [d for d in divisors if d * per_sample_bytes <= budget_bytes] or [1]
    if num_tc > 1:
        even = [d for d in fits if (n // d) % num_tc == 0]
        if even:                 # keep all TensorCores fed on 2-TC chips
            return max(even)
    return max(fits)             # 1-TC chips: biggest tile, fewest grid steps


# --------------------------------------------------------------------------
# Forward pass
# --------------------------------------------------------------------------
@functools.partial(
    jax.jit,
    static_argnames=("groups", "eps", "conv_dtype", "out_dtype", "lane_target",
                     "single_buffer_consts", "nchw_output"))
def block_forward(x_nchw, w_oihw, bias, gamma, beta, scale_shift=None, *,
                  groups=8, eps=1e-5, conv_dtype=jnp.bfloat16,
                  out_dtype=jnp.float32, lane_target=None,
                  single_buffer_consts=True, nchw_output=True):
    """Pallas version of Block.forward.  x_nchw: (N, C_in, H, W)."""
    N, C_in, H, W = x_nchw.shape
    C_out = w_oihw.shape[0]
    assert C_out % groups == 0, "GroupNorm groups must divide dim_out"

    if lane_target is None:
        kind = _device_kind()
        lane_target = 128 if ("v5 lite" in kind or "v5e" in kind) else 256

    # ---- capped W-fold: r lanes of W, W/r folded into the matmul M dim ------
    r = _pick_wfold(W, C_out, lane_target)
    Wt = W // r
    Kc = (r + 2) * C_in                # matmul K per kh band
    LC = r * C_out                     # lane-dense output width
    rows_in = (H + 2) * Wt
    rows_out = H * Wt

    # ---- raw padded NHWC slab (no im2col) -----------------------------------
    x_nhwc = jnp.transpose(x_nchw, (0, 2, 3, 1)).astype(jnp.float32)
    x_pad = jnp.pad(x_nhwc, ((0, 0), (1, 1), (1, 1), (0, 0)))   # (N,H+2,W+2,Ci)
    if Wt == 1:
        x_slab = x_pad.reshape(N, rows_in, Kc)
    else:
        win = jnp.arange(Wt)[:, None] * r + jnp.arange(r + 2)[None, :]
        x_slab = x_pad[:, :, win, :].reshape(N, rows_in, Kc)    # tiny overlap
    x_slab = x_slab.astype(conv_dtype)

    # ---- kw-banded conv weights: B_kh = sum_kw kron(shift(kw), w[:,:,kh,kw]) -
    bands = []
    for kh in range(3):
        band = jnp.zeros((Kc, LC), jnp.float32)
        for kw in range(3):
            shift_mat = jnp.eye(r + 2, r, k=-kw, dtype=jnp.float32)
            band = band + jnp.kron(shift_mat,
                                   w_oihw[:, :, kh, kw].T.astype(jnp.float32))
        bands.append(band)
    w_bands = jnp.stack(bands, axis=0).astype(conv_dtype)        # (3, Kc, LC)

    bias_w = jnp.tile(bias.astype(jnp.float32), r).reshape(1, LC)
    gamma_w = jnp.tile(gamma.astype(jnp.float32), r).reshape(1, LC)
    beta_w = jnp.tile(beta.astype(jnp.float32), r).reshape(1, LC)

    grp = (jnp.arange(LC) % C_out) // (C_out // groups)           # lane -> group
    gw = (grp[:, None] == jnp.arange(groups)[None, :]).astype(jnp.float32)
    gwt = gw.T

    has_ss = scale_shift is not None

    # ---- batch tile from the actual chip's VMEM -----------------------------
    conv_is = jnp.dtype(conv_dtype).itemsize
    out_is = jnp.dtype(out_dtype).itemsize
    cap = _vmem_capacity_bytes()
    num_tc = _num_tensorcores()
    const_bytes = (1 if single_buffer_consts else 2) * (
        3 * Kc * LC * conv_is + 3 * LC * 4 + 2 * LC * groups * 4)
    per_sample = 2 * (rows_in * Kc * conv_is + rows_out * LC * out_is
                      + (2 * LC * 4 if has_ss else 0))            # double buffer
    budget = max(per_sample, int(cap * 0.45) - const_bytes)
    nb = _pick_batch_tile(N, per_sample, budget, num_tc)

    def const_spec(shape):
        if single_buffer_consts:
            return pl.BlockSpec(shape, lambda i: (0,) * len(shape),
                                pipeline_mode=pl.Buffered(1))
        return pl.BlockSpec(shape, lambda i: (0,) * len(shape))

    args = [x_slab, w_bands, bias_w, gamma_w, beta_w, gw, gwt]
    in_specs = [
        pl.BlockSpec((nb, rows_in, Kc), lambda i: (i, 0, 0)),
        const_spec((3, Kc, LC)),
        const_spec((1, LC)),
        const_spec((1, LC)),
        const_spec((1, LC)),
        const_spec((LC, groups)),
        const_spec((groups, LC)),
    ]
    if has_ss:
        s, sh = scale_shift
        args.append(jnp.tile(s.reshape(N, C_out).astype(jnp.float32), (1, r)))
        args.append(jnp.tile(sh.reshape(N, C_out).astype(jnp.float32), (1, r)))
        in_specs.append(pl.BlockSpec((nb, LC), lambda i: (i, 0)))
        in_specs.append(pl.BlockSpec((nb, LC), lambda i: (i, 0)))

    kernel = functools.partial(_block_kernel, groups=groups, rows_out=rows_out,
                               wt=Wt, eps=eps, has_scale_shift=has_ss)

    cost = pl.CostEstimate(
        flops=2 * N * H * W * 9 * C_in * C_out,
        transcendentals=N * H * W * C_out,
        bytes_accessed=int(x_slab.size * conv_is + w_bands.size * conv_is
                           + N * rows_out * LC * out_is
                           + (2 * N * LC * 4 if has_ss else 0)))

    out_wide = pl.pallas_call(
        kernel,
        out_shape=jax.ShapeDtypeStruct((N, rows_out, LC), out_dtype),
        grid=(N // nb,),
        in_specs=in_specs,
        out_specs=pl.BlockSpec((nb, rows_out, LC), lambda i: (i, 0, 0)),
        compiler_params=pltpu.CompilerParams(
            dimension_semantics=("parallel",),
            vmem_limit_bytes=int(cap * 0.7)),
        cost_estimate=cost,
    )(*args)

    if not nchw_output:
        return out_wide        # (N, H*Wt, r*C_out) lane-dense slab for fusion
    out = out_wide.reshape(N, H, Wt, r, C_out)
    return jnp.transpose(out, (0, 4, 1, 2, 3)).reshape(N, C_out, H, W)


# --------------------------------------------------------------------------
# Pure-JAX reference (PyTorch module semantics, NCHW)
# --------------------------------------------------------------------------
def _reference(x, w, b, gamma, beta, scale_shift, *, groups, eps=1e-5):
    y = lax.conv_general_dilated(
        x, w, window_strides=(1, 1), padding=((1, 1), (1, 1)),
        dimension_numbers=("NCHW", "OIHW", "NCHW"),
        precision=lax.Precision.HIGHEST)
    y = y + b[None, :, None, None]
    N, C, H, W = y.shape
    yg = y.reshape(N, groups, C // groups, H, W)
    mean = yg.mean(axis=(2, 3, 4), keepdims=True)
    var = yg.var(axis=(2, 3, 4), keepdims=True)
    yn = ((yg - mean) / jnp.sqrt(var + eps)).reshape(N, C, H, W)
    yn = yn * gamma[None, :, None, None] + beta[None, :, None, None]
    if scale_shift is not None:
        s, sh = scale_shift
        yn = yn * (s + 1.0) + sh
    return yn * jax.nn.sigmoid(yn)


if __name__ == "__main__":
    key = jax.random.PRNGKey(0)
    N, C_in, H, W = 2, 4, 16, 16          # small shapes consistent with Block
    C_out, groups = 16, 8                 # dim=4, dim_out=16, groups=8

    k = jax.random.split(key, 7)
    x = jax.random.normal(k[0], (N, C_in, H, W), jnp.float32)
    w = 0.1 * jax.random.normal(k[1], (C_out, C_in, 3, 3), jnp.float32)
    b = 0.1 * jax.random.normal(k[2], (C_out,), jnp.float32)
    gamma = 1.0 + 0.1 * jax.random.normal(k[3], (C_out,), jnp.float32)
    beta = 0.1 * jax.random.normal(k[4], (C_out,), jnp.float32)
    # time-embedding style scale/shift, shape (N, C_out, 1, 1)
    scale = 0.1 * jax.random.normal(k[5], (N, C_out, 1, 1), jnp.float32)
    shift = 0.1 * jax.random.normal(k[6], (N, C_out, 1, 1), jnp.float32)

    # Prefer single-buffered constant operands; fall back cleanly if this
    # jaxlib does not accept pipeline_mode=pl.Buffered(1) on pallas_call specs.
    sb = True
    try:
        out = jax.block_until_ready(
            block_forward(x, w, b, gamma, beta, (scale, shift), groups=groups,
                          single_buffer_consts=True))
    except Exception:
        sb = False
        out = jax.block_until_ready(
            block_forward(x, w, b, gamma, beta, (scale, shift), groups=groups,
                          single_buffer_consts=False))

    # Tight check: reference fed the same bf16-rounded conv operands, so the
    # only remaining differences are accumulation order / transcendental impls.
    x_r = x.astype(jnp.bfloat16).astype(jnp.float32)
    w_r = w.astype(jnp.bfloat16).astype(jnp.float32)
    ref_m = _reference(x_r, w_r, b, gamma, beta, (scale, shift), groups=groups)
    err_m = float(jnp.max(jnp.abs(out - ref_m)))
    assert jnp.allclose(out, ref_m, atol=5e-3, rtol=5e-3), f"matched-ref err {err_m}"

    # Loose sanity bound vs the full-f32 reference (difference = bf16 rounding).
    ref_f = _reference(x, w, b, gamma, beta, (scale, shift), groups=groups)
    err_f = float(jnp.max(jnp.abs(out - ref_f)))
    assert err_f < 1.5e-1, f"f32-ref err {err_f}"

    # scale_shift=None path (statically drops its DMAs and the extra FMA).
    out2 = jax.block_until_ready(
        block_forward(x, w, b, gamma, beta, None, groups=groups,
                      single_buffer_consts=sb))
    ref2 = _reference(x_r, w_r, b, gamma, beta, None, groups=groups)
    err2 = float(jnp.max(jnp.abs(out2 - ref2)))
    assert jnp.allclose(out2, ref2, atol=5e-3, rtol=5e-3), f"no-ss err {err2}"

    print("KERNEL_OK")
</pallas_src>

<mosaic_0001>
module attributes {stable_mosaic.version = 11 : i64} {
  func.func @_block_kernel(%arg0: i32, %arg1: memref<2x18x72xbf16, #tpu.memory_space<vmem>>, %arg2: memref<3x72x256xbf16, #tpu.memory_space<vmem>>, %arg3: memref<1x256xf32, #tpu.memory_space<vmem>>, %arg4: memref<1x256xf32, #tpu.memory_space<vmem>>, %arg5: memref<1x256xf32, #tpu.memory_space<vmem>>, %arg6: memref<256x8xf32, #tpu.memory_space<vmem>>, %arg7: memref<8x256xf32, #tpu.memory_space<vmem>>, %arg8: memref<2x256xf32, #tpu.memory_space<vmem>>, %arg9: memref<2x256xf32, #tpu.memory_space<vmem>>, %arg10: memref<2x16x256xf32, #tpu.memory_space<vmem>>) attributes {dimension_semantics = [#tpu.dimension_semantics<parallel>], iteration_bounds = array<i64: 1>, scalar_prefetch = 0 : i64, scratch_operands = 0 : i64, tpu.core_type = #tpu.core_type<tc>, window_params = [{transform_indices = @transform_0, window_bounds = array<i64: 2, 18, 72>}, {pipeline_mode = #tpu.pipeline_mode<synchronous>, transform_indices = @transform_1, window_bounds = array<i64: 3, 72, 256>}, {pipeline_mode = #tpu.pipeline_mode<synchronous>, transform_indices = @transform_2, window_bounds = array<i64: 1, 256>}, {pipeline_mode = #tpu.pipeline_mode<synchronous>, transform_indices = @transform_3, window_bounds = array<i64: 1, 256>}, {pipeline_mode = #tpu.pipeline_mode<synchronous>, transform_indices = @transform_4, window_bounds = array<i64: 1, 256>}, {pipeline_mode = #tpu.pipeline_mode<synchronous>, transform_indices = @transform_5, window_bounds = array<i64: 256, 8>}, {pipeline_mode = #tpu.pipeline_mode<synchronous>, transform_indices = @transform_6, window_bounds = array<i64: 8, 256>}, {transform_indices = @transform_7, window_bounds = array<i64: 2, 256>}, {transform_indices = @transform_8, window_bounds = array<i64: 2, 256>}, {transform_indices = @transform_9, window_bounds = array<i64: 2, 16, 256>}]} {
    %c0 = arith.constant 0 : index
    %c0_0 = arith.constant 0 : index
    %c0_1 = arith.constant 0 : index
    %0 = vector.load %arg1[%c0, %c0_0, %c0_1] : memref<2x18x72xbf16, #tpu.memory_space<vmem>>, vector<2x18x72xbf16>
    %1 = vector.extract_strided_slice %0 {offsets = [0, 0, 0], sizes = [2, 16, 72], strides = [1, 1, 1]} : vector<2x18x72xbf16> to vector<2x16x72xbf16>
    %2 = vector.shape_cast %1 : vector<2x16x72xbf16> to vector<32x72xbf16>
    %c0_2 = arith.constant 0 : index
    %c0_3 = arith.constant 0 : index
    %c0_4 = arith.constant 0 : index
    %3 = vector.load %arg2[%c0_2, %c0_3, %c0_4] : memref<3x72x256xbf16, #tpu.memory_space<vmem>>, vector<1x72x256xbf16>
    %4 = vector.shape_cast %3 : vector<1x72x256xbf16> to vector<72x256xbf16>
    %cst = arith.constant dense<0.000000e+00> : vector<32x256xf32>
    %5 = tpu.matmul %2, %4, %cst {dimension_numbers = #tpu.dot_dimension_numbers<[1], [0], [0], [1], [0, 0, 1, 1], [], []>} : vector<32x72xbf16>, vector<72x256xbf16>, vector<32x256xf32> -> vector<32x256xf32>
    %6 = vector.shape_cast %5 : vector<32x256xf32> to vector<2x16x256xf32>
    %7 = vector.extract_strided_slice %0 {offsets = [0, 1, 0], sizes = [2, 16, 72], strides = [1, 1, 1]} : vector<2x18x72xbf16> to vector<2x16x72xbf16>
    %8 = vector.shape_cast %7 : vector<2x16x72xbf16> to vector<32x72xbf16>
    %c1 = arith.constant 1 : index
    %c0_5 = arith.constant 0 : index
    %c0_6 = arith.constant 0 : index
    %9 = vector.load %arg2[%c1, %c0_5, %c0_6] : memref<3x72x256xbf16, #tpu.memory_space<vmem>>, vector<1x72x256xbf16>
    %10 = vector.shape_cast %9 : vector<1x72x256xbf16> to vector<72x256xbf16>
    %cst_7 = arith.constant dense<0.000000e+00> : vector<32x256xf32>
    %11 = tpu.matmul %8, %10, %cst_7 {dimension_numbers = #tpu.dot_dimension_numbers<[1], [0], [0], [1], [0, 0, 1, 1], [], []>} : vector<32x72xbf16>, vector<72x256xbf16>, vector<32x256xf32> -> vector<32x256xf32>
    %12 = vector.shape_cast %11 : vector<32x256xf32> to vector<2x16x256xf32>
    %13 = arith.addf %6, %12 : vector<2x16x256xf32>
    %14 = vector.extract_strided_slice %0 {offsets = [0, 2, 0], sizes = [2, 16, 72], strides = [1, 1, 1]} : vector<2x18x72xbf16> to vector<2x16x72xbf16>
    %15 = vector.shape_cast %14 : vector<2x16x72xbf16> to vector<32x72xbf16>
    %c2 = arith.constant 2 : index
    %c0_8 = arith.constant 0 : index
    %c0_9 = arith.constant 0 : index
    %16 = vector.load %arg2[%c2, %c0_8, %c0_9] : memref<3x72x256xbf16, #tpu.memory_space<vmem>>, vector<1x72x256xbf16>
    %17 = vector.shape_cast %16 : vector<1x72x256xbf16> to vector<72x256xbf16>
    %cst_10 = arith.constant dense<0.000000e+00> : vector<32x256xf32>
    %18 = tpu.matmul %15, %17, %cst_10 {dimension_numbers = #tpu.dot_dimension_numbers<[1], [0], [0], [1], [0, 0, 1, 1], [], []>} : vector<32x72xbf16>, vector<72x256xbf16>, vector<32x256xf32> -> vector<32x256xf32>
    %19 = vector.shape_cast %18 : vector<32x256xf32> to vector<2x16x256xf32>
    %20 = arith.addf %13, %19 : vector<2x16x256xf32>
    %c0_11 = arith.constant 0 : index
    %c0_12 = arith.constant 0 : index
    %21 = vector.load %arg3[%c0_11, %c0_12] : memref<1x256xf32, #tpu.memory_space<vmem>>, vector<1x256xf32>
    %cst_13 = arith.constant dense<0.000000e+00> : vector<2x256xf32>
    %22 = vector.multi_reduction <add>, %20, %cst_13 [1] : vector<2x16x256xf32> to vector<2x256xf32>
    %23 = arith.mulf %20, %20 : vector<2x16x256xf32>
    %cst_14 = arith.constant dense<0.000000e+00> : vector<2x256xf32>
    %24 = vector.multi_reduction <add>, %23, %cst_14 [1] : vector<2x16x256xf32> to vector<2x256xf32>
    %cst_15 = arith.constant 2.000000e+00 : f32
    %25 = vector.broadcast %cst_15 : f32 to vector<1x256xf32>
    %26 = arith.mulf %25, %21 : vector<1x256xf32>
    %27 = vector.broadcast %26 : vector<1x256xf32> to vector<2x256xf32>
    %28 = arith.mulf %27, %22 : vector<2x256xf32>
    %29 = arith.addf %24, %28 : vector<2x256xf32>
    %cst_16 = arith.constant 1.600000e+01 : f32
    %30 = vector.broadcast %cst_16 : f32 to vector<1x256xf32>
    %31 = arith.mulf %30, %21 : vector<1x256xf32>
    %32 = arith.mulf %31, %21 : vector<1x256xf32>
    %33 = vector.broadcast %32 : vector<1x256xf32> to vector<2x256xf32>
    %34 = arith.addf %29, %33 : vector<2x256xf32>
    %cst_17 = arith.constant 1.600000e+01 : f32
    %35 = vector.broadcast %cst_17 : f32 to vector<1x256xf32>
    %36 = arith.mulf %35, %21 : vector<1x256xf32>
    %37 = vector.broadcast %36 : vector<1x256xf32> to vector<2x256xf32>
    %38 = arith.addf %22, %37 : vector<2x256xf32>
    %cst_18 = arith.constant 1.600000e+01 : f32
    %cst_19 = arith.constant 3.200000e+01 : f32
    %39 = arith.mulf %cst_18, %cst_19 : f32
    %40 = tpu.concatenate %38, %34 in 0 : vector<2x256xf32>, vector<2x256xf32> -> vector<4x256xf32>
    %c0_20 = arith.constant 0 : index
    %c0_21 = arith.constant 0 : index
    %41 = vector.load %arg6[%c0_20, %c0_21] : memref<256x8xf32, #tpu.memory_space<vmem>>, vector<256x8xf32>
    %cst_22 = arith.constant dense<0.000000e+00> : vector<4x8xf32>
    %42 = tpu.matmul %40, %41, %cst_22 {dimension_numbers = #tpu.dot_dimension_numbers<[1], [0], [0], [1], [0, 0, 1, 1], [], []>} : vector<4x256xf32>, vector<256x8xf32>, vector<4x8xf32> -> vector<4x8xf32>
    %43 = vector.broadcast %39 : f32 to vector<4x8xf32>
    %44 = arith.divf %42, %43 : vector<4x8xf32>
    %45 = vector.extract_strided_slice %44 {offsets = [0, 0], sizes = [2, 8], strides = [1, 1]} : vector<4x8xf32> to vector<2x8xf32>
    %46 = vector.extract_strided_slice %44 {offsets = [2, 0], sizes = [2, 8], strides = [1, 1]} : vector<4x8xf32> to vector<2x8xf32>
    %47 = arith.mulf %45, %45 : vector<2x8xf32>
    %48 = arith.subf %46, %47 : vector<2x8xf32>
    %cst_23 = arith.constant 9.99999974E-6 : f32
    %49 = vector.broadcast %cst_23 : f32 to vector<2x8xf32>
    %50 = arith.addf %48, %49 : vector<2x8xf32>
    %51 = math.rsqrt %50 : vector<2x8xf32>
    %52 = tpu.concatenate %45, %51 in 0 : vector<2x8xf32>, vector<2x8xf32> -> vector<4x8xf32>
    %c0_24 = arith.constant 0 : index
    %c0_25 = arith.constant 0 : index
    %53 = vector.load %arg7[%c0_24, %c0_25] : memref<8x256xf32, #tpu.memory_space<vmem>>, vector<8x256xf32>
    %cst_26 = arith.constant dense<0.000000e+00> : vector<4x256xf32>
    %54 = tpu.matmul %52, %53, %cst_26 {dimension_numbers = #tpu.dot_dimension_numbers<[1], [0], [0], [1], [0, 0, 1, 1], [], []>} : vector<4x8xf32>, vector<8x256xf32>, vector<4x256xf32> -> vector<4x256xf32>
    %55 = vector.extract_strided_slice %54 {offsets = [0, 0], sizes = [2, 256], strides = [1, 1]} : vector<4x256xf32> to vector<2x256xf32>
    %56 = vector.extract_strided_slice %54 {offsets = [2, 0], sizes = [2, 256], strides = [1, 1]} : vector<4x256xf32> to vector<2x256xf32>
    %c0_27 = arith.constant 0 : index
    %c0_28 = arith.constant 0 : index
    %57 = vector.load %arg4[%c0_27, %c0_28] : memref<1x256xf32, #tpu.memory_space<vmem>>, vector<1x256xf32>
    %58 = vector.broadcast %57 : vector<1x256xf32> to vector<2x256xf32>
    %59 = arith.mulf %56, %58 : vector<2x256xf32>
    %c0_29 = arith.constant 0 : index
    %c0_30 = arith.constant 0 : index
    %60 = vector.load %arg5[%c0_29, %c0_30] : memref<1x256xf32, #tpu.memory_space<vmem>>, vector<1x256xf32>
    %61 = vector.broadcast %21 : vector<1x256xf32> to vector<2x256xf32>
    %62 = arith.subf %61, %55 : vector<2x256xf32>
    %63 = arith.mulf %62, %59 : vector<2x256xf32>
    %64 = vector.broadcast %60 : vector<1x256xf32> to vector<2x256xf32>
    %65 = arith.addf %64, %63 : vector<2x256xf32>
    %c0_31 = arith.constant 0 : index
    %c0_32 = arith.constant 0 : index
    %66 = vector.load %arg8[%c0_31, %c0_32] : memref<2x256xf32, #tpu.memory_space<vmem>>, vector<2x256xf32>
    %cst_33 = arith.constant 1.000000e+00 : f32
    %67 = vector.broadcast %cst_33 : f32 to vector<2x256xf32>
    %68 = arith.addf %66, %67 : vector<2x256xf32>
    %69 = arith.mulf %59, %68 : vector<2x256xf32>
    %70 = arith.mulf %65, %68 : vector<2x256xf32>
    %c0_34 = arith.constant 0 : index
    %c0_35 = arith.constant 0 : index
    %71 = vector.load %arg9[%c0_34, %c0_35] : memref<2x256xf32, #tpu.memory_space<vmem>>, vector<2x256xf32>
    %72 = arith.addf %70, %71 : vector<2x256xf32>
    %73 = vector.shape_cast %69 : vector<2x256xf32> to vector<2x1x256xf32>
    %74 = vector.broadcast %73 : vector<2x1x256xf32> to vector<2x16x256xf32>
    %75 = arith.mulf %20, %74 : vector<2x16x256xf32>
    %76 = vector.shape_cast %72 : vector<2x256xf32> to vector<2x1x256xf32>
    %77 = vector.broadcast %76 : vector<2x1x256xf32> to vector<2x16x256xf32>
    %78 = arith.addf %75, %77 : vector<2x16x256xf32>
    %79 = arith.negf %78 : vector<2x16x256xf32>
    %80 = math.exp %79 : vector<2x16x256xf32>
    %cst_36 = arith.constant 1.000000e+00 : f32
    %81 = vector.broadcast %cst_36 : f32 to vector<2x16x256xf32>
    %82 = arith.addf %81, %80 : vector<2x16x256xf32>
    %83 = arith.divf %81, %82 : vector<2x16x256xf32>
    %84 = arith.mulf %78, %83 : vector<2x16x256xf32>
    %c0_37 = arith.constant 0 : index
    %c0_38 = arith.constant 0 : index
    %c0_39 = arith.constant 0 : index
    %85 = vector.load %arg10[%c0_37, %c0_38, %c0_39] : memref<2x16x256xf32, #tpu.memory_space<vmem>>, vector<2x16x256xf32>
    tpu.vector_store %arg10[%c0_37, %c0_38, %c0_39], %84 {strides = array<i32>} : memref<2x16x256xf32, #tpu.memory_space<vmem>>, vector<2x16x256xf32>,
    return
  }
  func.func @transform_0(%arg0: i32) -> (i32, i32, i32) {
    %c0_i32 = arith.constant 0 : i32
    %c0_i32_0 = arith.constant 0 : i32
    %c0_i32_1 = arith.constant 0 : i32
    return %arg0, %c0_i32, %c0_i32_0 : i32, i32, i32
  }
  func.func @transform_1(%arg0: i32) -> (i32, i32, i32) {
    %c0_i32 = arith.constant 0 : i32
    %c0_i32_0 = arith.constant 0 : i32
    %c0_i32_1 = arith.constant 0 : i32
    %c0_i32_2 = arith.constant 0 : i32
    return %c0_i32, %c0_i32_0, %c0_i32_1 : i32, i32, i32
  }
  func.func @transform_2(%arg0: i32) -> (i32, i32) {
    %c0_i32 = arith.constant 0 : i32
    %c0_i32_0 = arith.constant 0 : i32
    %c0_i32_1 = arith.constant 0 : i32
    return %c0_i32, %c0_i32_0 : i32, i32
  }
  func.func @transform_3(%arg0: i32) -> (i32, i32) {
    %c0_i32 = arith.constant 0 : i32
    %c0_i32_0 = arith.constant 0 : i32
    %c0_i32_1 = arith.constant 0 : i32
    return %c0_i32, %c0_i32_0 : i32, i32
  }
  func.func @transform_4(%arg0: i32) -> (i32, i32) {
    %c0_i32 = arith.constant 0 : i32
    %c0_i32_0 = arith.constant 0 : i32
    %c0_i32_1 = arith.constant 0 : i32
    return %c0_i32, %c0_i32_0 : i32, i32
  }
  func.func @transform_5(%arg0: i32) -> (i32, i32) {
    %c0_i32 = arith.constant 0 : i32
    %c0_i32_0 = arith.constant 0 : i32
    %c0_i32_1 = arith.constant 0 : i32
    return %c0_i32, %c0_i32_0 : i32, i32
  }
  func.func @transform_6(%arg0: i32) -> (i32, i32) {
    %c0_i32 = arith.constant 0 : i32
    %c0_i32_0 = arith.constant 0 : i32
    %c0_i32_1 = arith.constant 0 : i32
    return %c0_i32, %c0_i32_0 : i32, i32
  }
  func.func @transform_7(%arg0: i32) -> (i32, i32) {
    %c0_i32 = arith.constant 0 : i32
    %c0_i32_0 = arith.constant 0 : i32
    return %arg0, %c0_i32 : i32, i32
  }
  func.func @transform_8(%arg0: i32) -> (i32, i32) {
    %c0_i32 = arith.constant 0 : i32
    %c0_i32_0 = arith.constant 0 : i32
    return %arg0, %c0_i32 : i32, i32
  }
  func.func @transform_9(%arg0: i32) -> (i32, i32, i32) {
    %c0_i32 = arith.constant 0 : i32
    %c0_i32_0 = arith.constant 0 : i32
    %c0_i32_1 = arith.constant 0 : i32
    return %arg0, %c0_i32, %c0_i32_0 : i32, i32, i32
  }
}

module attributes {stable_mosaic.version = 11 : i64} {
  func.func @_block_kernel(%arg0: i32, %arg1: memref<2x18x72xbf16, #tpu.memory_space<vmem>>, %arg2: memref<3x72x256xbf16, #tpu.memory_space<vmem>>, %arg3: memref<1x256xf32, #tpu.memory_space<vmem>>, %arg4: memref<1x256xf32, #tpu.memory_space<vmem>>, %arg5: memref<1x256xf32, #tpu.memory_space<vmem>>, %arg6: memref<256x8xf32, #tpu.memory_space<vmem>>, %arg7: memref<8x256xf32, #tpu.memory_space<vmem>>, %arg8: memref<2x256xf32, #tpu.memory_space<vmem>>, %arg9: memref<2x256xf32, #tpu.memory_space<vmem>>, %arg10: memref<2x16x256xf32, #tpu.memory_space<vmem>>) attributes {dimension_semantics = [#tpu.dimension_semantics<parallel>], iteration_bounds = array<i64: 1>, scalar_prefetch = 0 : i64, scratch_operands = 0 : i64, tpu.core_type = #tpu.core_type<tc>, window_params = [{transform_indices = @transform_0, window_bounds = array<i64: 2, 18, 72>}, {pipeline_mode = #tpu.pipeline_mode<synchronous>, transform_indices = @transform_1, window_bounds = array<i64: 3, 72, 256>}, {pipeline_mode = #tpu.pipeline_mode<synchronous>, transform_indices = @transform_2, window_bounds = array<i64: 1, 256>}, {pipeline_mode = #tpu.pipeline_mode<synchronous>, transform_indices = @transform_3, window_bounds = array<i64: 1, 256>}, {pipeline_mode = #tpu.pipeline_mode<synchronous>, transform_indices = @transform_4, window_bounds = array<i64: 1, 256>}, {pipeline_mode = #tpu.pipeline_mode<synchronous>, transform_indices = @transform_5, window_bounds = array<i64: 256, 8>}, {pipeline_mode = #tpu.pipeline_mode<synchronous>, transform_indices = @transform_6, window_bounds = array<i64: 8, 256>}, {transform_indices = @transform_7, window_bounds = array<i64: 2, 256>}, {transform_indices = @transform_8, window_bounds = array<i64: 2, 256>}, {transform_indices = @transform_9, window_bounds = array<i64: 2, 16, 256>}]} {
    %c0 = arith.constant 0 : index
    %c0_0 = arith.constant 0 : index
    %c0_1 = arith.constant 0 : index
    %0 = vector.load %arg1[%c0, %c0_0, %c0_1] : memref<2x18x72xbf16, #tpu.memory_space<vmem>>, vector<2x18x72xbf16>
    %1 = vector.extract_strided_slice %0 {offsets = [0, 0, 0], sizes = [2, 16, 72], strides = [1, 1, 1]} : vector<2x18x72xbf16> to vector<2x16x72xbf16>
    %2 = vector.shape_cast %1 : vector<2x16x72xbf16> to vector<32x72xbf16>
    %c0_2 = arith.constant 0 : index
    %c0_3 = arith.constant 0 : index
    %c0_4 = arith.constant 0 : index
    %3 = vector.load %arg2[%c0_2, %c0_3, %c0_4] : memref<3x72x256xbf16, #tpu.memory_space<vmem>>, vector<1x72x256xbf16>
    %4 = vector.shape_cast %3 : vector<1x72x256xbf16> to vector<72x256xbf16>
    %cst = arith.constant dense<0.000000e+00> : vector<32x256xf32>
    %5 = tpu.matmul %2, %4, %cst {dimension_numbers = #tpu.dot_dimension_numbers<[1], [0], [0], [1], [0, 0, 1, 1], [], []>} : vector<32x72xbf16>, vector<72x256xbf16>, vector<32x256xf32> -> vector<32x256xf32>
    %6 = vector.shape_cast %5 : vector<32x256xf32> to vector<2x16x256xf32>
    %7 = vector.extract_strided_slice %0 {offsets = [0, 1, 0], sizes = [2, 16, 72], strides = [1, 1, 1]} : vector<2x18x72xbf16> to vector<2x16x72xbf16>
    %8 = vector.shape_cast %7 : vector<2x16x72xbf16> to vector<32x72xbf16>
    %c1 = arith.constant 1 : index
    %c0_5 = arith.constant 0 : index
    %c0_6 = arith.constant 0 : index
    %9 = vector.load %arg2[%c1, %c0_5, %c0_6] : memref<3x72x256xbf16, #tpu.memory_space<vmem>>, vector<1x72x256xbf16>
    %10 = vector.shape_cast %9 : vector<1x72x256xbf16> to vector<72x256xbf16>
    %cst_7 = arith.constant dense<0.000000e+00> : vector<32x256xf32>
    %11 = tpu.matmul %8, %10, %cst_7 {dimension_numbers = #tpu.dot_dimension_numbers<[1], [0], [0], [1], [0, 0, 1, 1], [], []>} : vector<32x72xbf16>, vector<72x256xbf16>, vector<32x256xf32> -> vector<32x256xf32>
    %12 = vector.shape_cast %11 : vector<32x256xf32> to vector<2x16x256xf32>
    %13 = arith.addf %6, %12 : vector<2x16x256xf32>
    %14 = vector.extract_strided_slice %0 {offsets = [0, 2, 0], sizes = [2, 16, 72], strides = [1, 1, 1]} : vector<2x18x72xbf16> to vector<2x16x72xbf16>
    %15 = vector.shape_cast %14 : vector<2x16x72xbf16> to vector<32x72xbf16>
    %c2 = arith.constant 2 : index
    %c0_8 = arith.constant 0 : index
    %c0_9 = arith.constant 0 : index
    %16 = vector.load %arg2[%c2, %c0_8, %c0_9] : memref<3x72x256xbf16, #tpu.memory_space<vmem>>, vector<1x72x256xbf16>
    %17 = vector.shape_cast %16 : vector<1x72x256xbf16> to vector<72x256xbf16>
    %cst_10 = arith.constant dense<0.000000e+00> : vector<32x256xf32>
    %18 = tpu.matmul %15, %17, %cst_10 {dimension_numbers = #tpu.dot_dimension_numbers<[1], [0], [0], [1], [0, 0, 1, 1], [], []>} : vector<32x72xbf16>, vector<72x256xbf16>, vector<32x256xf32> -> vector<32x256xf32>
    %19 = vector.shape_cast %18 : vector<32x256xf32> to vector<2x16x256xf32>
    %20 = arith.addf %13, %19 : vector<2x16x256xf32>
    %c0_11 = arith.constant 0 : index
    %c0_12 = arith.constant 0 : index
    %21 = vector.load %arg3[%c0_11, %c0_12] : memref<1x256xf32, #tpu.memory_space<vmem>>, vector<1x256xf32>
    %cst_13 = arith.constant dense<0.000000e+00> : vector<2x256xf32>
    %22 = vector.multi_reduction <add>, %20, %cst_13 [1] : vector<2x16x256xf32> to vector<2x256xf32>
    %23 = arith.mulf %20, %20 : vector<2x16x256xf32>
    %cst_14 = arith.constant dense<0.000000e+00> : vector<2x256xf32>
    %24 = vector.multi_reduction <add>, %23, %cst_14 [1] : vector<2x16x256xf32> to vector<2x256xf32>
    %cst_15 = arith.constant 2.000000e+00 : f32
    %25 = vector.broadcast %cst_15 : f32 to vector<1x256xf32>
    %26 = arith.mulf %25, %21 : vector<1x256xf32>
    %27 = vector.broadcast %26 : vector<1x256xf32> to vector<2x256xf32>
    %28 = arith.mulf %27, %22 : vector<2x256xf32>
    %29 = arith.addf %24, %28 : vector<2x256xf32>
    %cst_16 = arith.constant 1.600000e+01 : f32
    %30 = vector.broadcast %cst_16 : f32 to vector<1x256xf32>
    %31 = arith.mulf %30, %21 : vector<1x256xf32>
    %32 = arith.mulf %31, %21 : vector<1x256xf32>
    %33 = vector.broadcast %32 : vector<1x256xf32> to vector<2x256xf32>
    %34 = arith.addf %29, %33 : vector<2x256xf32>
    %cst_17 = arith.constant 1.600000e+01 : f32
    %35 = vector.broadcast %cst_17 : f32 to vector<1x256xf32>
    %36 = arith.mulf %35, %21 : vector<1x256xf32>
    %37 = vector.broadcast %36 : vector<1x256xf32> to vector<2x256xf32>
    %38 = arith.addf %22, %37 : vector<2x256xf32>
    %cst_18 = arith.constant 1.600000e+01 : f32
    %cst_19 = arith.constant 3.200000e+01 : f32
    %39 = arith.mulf %cst_18, %cst_19 : f32
    %40 = tpu.concatenate %38, %34 in 0 : vector<2x256xf32>, vector<2x256xf32> -> vector<4x256xf32>
    %c0_20 = arith.constant 0 : index
    %c0_21 = arith.constant 0 : index
    %41 = vector.load %arg6[%c0_20, %c0_21] : memref<256x8xf32, #tpu.memory_space<vmem>>, vector<256x8xf32>
    %cst_22 = arith.constant dense<0.000000e+00> : vector<4x8xf32>
    %42 = tpu.matmul %40, %41, %cst_22 {dimension_numbers = #tpu.dot_dimension_numbers<[1], [0], [0], [1], [0, 0, 1, 1], [], []>} : vector<4x256xf32>, vector<256x8xf32>, vector<4x8xf32> -> vector<4x8xf32>
    %43 = vector.broadcast %39 : f32 to vector<4x8xf32>
    %44 = arith.divf %42, %43 : vector<4x8xf32>
    %45 = vector.extract_strided_slice %44 {offsets = [0, 0], sizes = [2, 8], strides = [1, 1]} : vector<4x8xf32> to vector<2x8xf32>
    %46 = vector.extract_strided_slice %44 {offsets = [2, 0], sizes = [2, 8], strides = [1, 1]} : vector<4x8xf32> to vector<2x8xf32>
    %47 = arith.mulf %45, %45 : vector<2x8xf32>
    %48 = arith.subf %46, %47 : vector<2x8xf32>
    %cst_23 = arith.constant 9.99999974E-6 : f32
    %49 = vector.broadcast %cst_23 : f32 to vector<2x8xf32>
    %50 = arith.addf %48, %49 : vector<2x8xf32>
    %51 = math.rsqrt %50 : vector<2x8xf32>
    %52 = tpu.concatenate %45, %51 in 0 : vector<2x8xf32>, vector<2x8xf32> -> vector<4x8xf32>
    %c0_24 = arith.constant 0 : index
    %c0_25 = arith.constant 0 : index
    %53 = vector.load %arg7[%c0_24, %c0_25] : memref<8x256xf32, #tpu.memory_space<vmem>>, vector<8x256xf32>
    %cst_26 = arith.constant dense<0.000000e+00> : vector<4x256xf32>
    %54 = tpu.matmul %52, %53, %cst_26 {dimension_numbers = #tpu.dot_dimension_numbers<[1], [0], [0], [1], [0, 0, 1, 1], [], []>} : vector<4x8xf32>, vector<8x256xf32>, vector<4x256xf32> -> vector<4x256xf32>
    %55 = vector.extract_strided_slice %54 {offsets = [0, 0], sizes = [2, 256], strides = [1, 1]} : vector<4x256xf32> to vector<2x256xf32>
    %56 = vector.extract_strided_slice %54 {offsets = [2, 0], sizes = [2, 256], strides = [1, 1]} : vector<4x256xf32> to vector<2x256xf32>
    %c0_27 = arith.constant 0 : index
    %c0_28 = arith.constant 0 : index
    %57 = vector.load %arg4[%c0_27, %c0_28] : memref<1x256xf32, #tpu.memory_space<vmem>>, vector<1x256xf32>
    %58 = vector.broadcast %57 : vector<1x256xf32> to vector<2x256xf32>
    %59 = arith.mulf %56, %58 : vector<2x256xf32>
    %c0_29 = arith.constant 0 : index
    %c0_30 = arith.constant 0 : index
    %60 = vector.load %arg5[%c0_29, %c0_30] : memref<1x256xf32, #tpu.memory_space<vmem>>, vector<1x256xf32>
    %61 = vector.broadcast %21 : vector<1x256xf32> to vector<2x256xf32>
    %62 = arith.subf %61, %55 : vector<2x256xf32>
    %63 = arith.mulf %62, %59 : vector<2x256xf32>
    %64 = vector.broadcast %60 : vector<1x256xf32> to vector<2x256xf32>
    %65 = arith.addf %64, %63 : vector<2x256xf32>
    %c0_31 = arith.constant 0 : index
    %c0_32 = arith.constant 0 : index
    %66 = vector.load %arg8[%c0_31, %c0_32] : memref<2x256xf32, #tpu.memory_space<vmem>>, vector<2x256xf32>
    %cst_33 = arith.constant 1.000000e+00 : f32
    %67 = vector.broadcast %cst_33 : f32 to vector<2x256xf32>
    %68 = arith.addf %66, %67 : vector<2x256xf32>
    %69 = arith.mulf %59, %68 : vector<2x256xf32>
    %70 = arith.mulf %65, %68 : vector<2x256xf32>
    %c0_34 = arith.constant 0 : index
    %c0_35 = arith.constant 0 : index
    %71 = vector.load %arg9[%c0_34, %c0_35] : memref<2x256xf32, #tpu.memory_space<vmem>>, vector<2x256xf32>
    %72 = arith.addf %70, %71 : vector<2x256xf32>
    %73 = vector.shape_cast %69 : vector<2x256xf32> to vector<2x1x256xf32>
    %74 = vector.broadcast %73 : vector<2x1x256xf32> to vector<2x16x256xf32>
    %75 = arith.mulf %20, %74 : vector<2x16x256xf32>
    %76 = vector.shape_cast %72 : vector<2x256xf32> to vector<2x1x256xf32>
    %77 = vector.broadcast %76 : vector<2x1x256xf32> to vector<2x16x256xf32>
    %78 = arith.addf %75, %77 : vector<2x16x256xf32>
    %79 = arith.negf %78 : vector<2x16x256xf32>
    %80 = math.exp %79 : vector<2x16x256xf32>
    %cst_36 = arith.constant 1.000000e+00 : f32
    %81 = vector.broadcast %cst_36 : f32 to vector<2x16x256xf32>
    %82 = arith.addf %81, %80 : vector<2x16x256xf32>
    %83 = arith.divf %81, %82 : vector<2x16x256xf32>
    %84 = arith.mulf %78, %83 : vector<2x16x256xf32>
    %c0_37 = arith.constant 0 : index
    %c0_38 = arith.constant 0 : index
    %c0_39 = arith.constant 0 : index
    %85 = vector.load %arg10[%c0_37, %c0_38, %c0_39] : memref<2x16x256xf32, #tpu.memory_space<vmem>>, vector<2x16x256xf32>
    tpu.vector_store %arg10[%c0_37, %c0_38, %c0_39], %84 {strides = array<i32>} : memref<2x16x256xf32, #tpu.memory_space<vmem>>, vector<2x16x256xf32>,
    return
  }
  func.func @transform_0(%arg0: i32) -> (i32, i32, i32) {
    %c0_i32 = arith.constant 0 : i32
    %c0_i32_0 = arith.constant 0 : i32
    %c0_i32_1 = arith.constant 0 : i32
    return %arg0, %c0_i32, %c0_i32_0 : i32, i32, i32
  }
  func.func @transform_1(%arg0: i32) -> (i32, i32, i32) {
    %c0_i32 = arith.constant 0 : i32
    %c0_i32_0 = arith.constant 0 : i32
    %c0_i32_1 = arith.constant 0 : i32
    %c0_i32_2 = arith.constant 0 : i32
    return %c0_i32, %c0_i32_0, %c0_i32_1 : i32, i32, i32
  }
  func.func @transform_2(%arg0: i32) -> (i32, i32) {
    %c0_i32 = arith.constant 0 : i32
    %c0_i32_0 = arith.constant 0 : i32
    %c0_i32_1 = arith.constant 0 : i32
    return %c0_i32, %c0_i32_0 : i32, i32
  }
  func.func @transform_3(%arg0: i32) -> (i32, i32) {
    %c0_i32 = arith.constant 0 : i32
    %c0_i32_0 = arith.constant 0 : i32
    %c0_i32_1 = arith.constant 0 : i32
    return %c0_i32, %c0_i32_0 : i32, i32
  }
  func.func @transform_4(%arg0: i32) -> (i32, i32) {
    %c0_i32 = arith.constant 0 : i32
    %c0_i32_0 = arith.constant 0 : i32
    %c0_i32_1 = arith.constant 0 : i32
    return %c0_i32, %c0_i32_0 : i32, i32
  }
  func.func @transform_5(%arg0: i32) -> (i32, i32) {
    %c0_i32 = arith.constant 0 : i32
    %c0_i32_0 = arith.constant 0 : i32
    %c0_i32_1 = arith.constant 0 : i32
    return %c0_i32, %c0_i32_0 : i32, i32
  }
  func.func @transform_6(%arg0: i32) -> (i32, i32) {
    %c0_i32 = arith.constant 0 : i32
    %c0_i32_0 = arith.constant 0 : i32
    %c0_i32_1 = arith.constant 0 : i32
    return %c0_i32, %c0_i32_0 : i32, i32
  }
  func.func @transform_7(%arg0: i32) -> (i32, i32) {
    %c0_i32 = arith.constant 0 : i32
    %c0_i32_0 = arith.constant 0 : i32
    return %arg0, %c0_i32 : i32, i32
  }
  func.func @transform_8(%arg0: i32) -> (i32, i32) {
    %c0_i32 = arith.constant 0 : i32
    %c0_i32_0 = arith.constant 0 : i32
    return %arg0, %c0_i32 : i32, i32
  }
  func.func @transform_9(%arg0: i32) -> (i32, i32, i32) {
    %c0_i32 = arith.constant 0 : i32
    %c0_i32_0 = arith.constant 0 : i32
    %c0_i32_1 = arith.constant 0 : i32
    return %arg0, %c0_i32, %c0_i32_0 : i32, i32, i32
  }
}

</mosaic_0001>

<bundles_post_ra>
// kernel: tile.41
= control target key start
LH: loop header
LB: loop body
LE: loop exit
PB: predicated region body
PF: predicated region fallthrough
CT: control target
= control target key end

     0   :  { %s8_s6 = smov 3  ;;  %s11_s7 = smov 12  ;;  %vm13_vm0 = vcmask 1043458   ;;  %vm3_vm1 = vcmask 130048   ;;  %vm17_vm2 = vcmask 1048448   ;;  %vm31_vm3 = vcmask 917248   ;;  %s213_s0 = inlined_call_operand.vmem [shape: f32[2,16,16], index: 0, kind: input, shape index: {}]   ;;  %s214_s1 = inlined_call_operand.vmem [shape: f32[2,256], index: 1, kind: output, shape index: {}]  }
   0x1   :  { %v116_v0 = vld [vmem:[%s213_s0 + $0x7] ss:$16 sm:%s8_s6]   ;;  %v117_v1 = vld [vmem:[%s213_s0 - $0x11] ss:$16 sm:%s11_s7]   ;;  %s36_s12 = smov 3  ;;  %s39_s15 = smov 12 }
   0x2   :  { %v14_v2 = vsel %vm13_vm0, %v117_v1, %v116_v0  ;;  %v120_v3 = vld [vmem:[%s213_s0 + $0x5] ss:$16 sm:%s36_s12]   ;;  %s138_s16 = smov 112   ;;  %v121_v4 = vld [vmem:[%s213_s0 - $0x13] ss:$16 sm:%s39_s15]   ;;  %s22_s19 = smov 3 }
   0x3   :  { %15 = vrot.lane.b32.xlu0 %v14_v2, %s138_s16  ;;  %s25_s20 = smov 12  ;;  %v42_v5 = vsel %vm13_vm0, %v121_v4, %v120_v3  ;;  %v118_v6 = vld [vmem:[%s213_s0 + $0x6] ss:$16 sm:%s22_s19]   ;;  %s50_s25 = smov 3  ;;  %vm45_vm4 = vcmask 786048   ;;  %vm59_vm5 = vcmask 654848  }
   0x4   :  { %v119_v7 = vld [vmem:[%s213_s0 - $0x12] ss:$16 sm:%s25_s20]   ;;  %s139_s26 = smov 80   ;;  %v122_v9 = vld [vmem:[%s213_s0 + $0x4] ss:$16 sm:%s50_s25]   ;;  %s53_s29 = smov 12 }
   0x5   :  { %43 = vrot.lane.b32.xlu1 %v42_v5, %s139_s26  ;;  %v28_v8 = vsel %vm13_vm0, %v119_v7, %v118_v6  ;;  %v123_v10 = vld [vmem:[%s213_s0 - $0x14] ss:$16 sm:%s53_s29]   ;;  %s64_s3 = smov 3  ;;  %s67_s4 = smov 12  ;;  %vm73_vm6 = vcmask 523648   ;;  %vm87_vm7 = vcmask 392448  }
   0x6   :  { %s140_s5 = smov 96   ;;  %v56_v11 = vsel %vm13_vm0, %v123_v10, %v122_v9  ;;  %v124_v12 = vld [vmem:[%s213_s0 + $0x3] ss:$16 sm:%s64_s3]   ;;  %s78_s8 = smov 3  ;;  %v125_v13 = vld [vmem:[%s213_s0 - $0x15] ss:$16 sm:%s67_s4]  }
   0x7   :  { %29 = vrot.lane.b32.xlu0 %v28_v8, %s140_s5  ;;  %v126_v14 = vld [vmem:[%s213_s0 + $0x2] ss:$16 sm:%s78_s8]   ;;  %s81_s13 = smov 12  ;;  %s141_s14 = smov 64   ;;  %v70_v15 = vsel %vm13_vm0, %v125_v13, %v124_v12  ;;  %vm101_vm8 = vcmask 261248  }
   0x8   :  { %v127_v16 = vld [vmem:[%s213_s0 - $0x16] ss:$16 sm:%s81_s13]   ;;  %s92_s17 = smov 3  ;;  %s95_s18 = smov 12 }
   0x9   :  { %57 = vrot.lane.b32.xlu1 %v56_v11, %s141_s14  ;;  %v84_v17 = vsel %vm13_vm0, %v127_v16, %v126_v14  ;;  %v128_v18 = vld [vmem:[%s213_s0 + $0x1] ss:$16 sm:%s92_s17]   ;;  %s142_s23 = smov 48   ;;  %v2_v20 = vld [vmem:[%s213_s0] ss:$8 sm:$0xf]  }
   0xa   :  { %v129_v19 = vld [vmem:[%s213_s0 - $0x17] ss:$16 sm:%s95_s18]   ;;  %4 = vst.msk [vmem:[#allocation0] ss:$8 sm:$0x3] %vm3_vm1, %v2_v20   ;;  %s143_s0 = smov 32  }
   0xb   :  { %71 = vrot.lane.b32.xlu0 %v70_v15, %s142_s23  ;;  %v98_v21 = vsel %vm13_vm0, %v129_v19, %v128_v18  ;;  %6 = vst.msk [vmem:[#allocation0 - $0xf] ss:$8 sm:$0xc] %vm3_vm1, %v2_v20   ;;  %s144_s26 = smov 16  }
   0xd   :  { %85 = vrot.lane.b32.xlu1 %v84_v17, %s143_s0 }
   0xf   :  { %99 = vrot.lane.b32.xlu0 %v98_v21, %s144_s26 }
  0x75   :  { %v16_v22 = vpop.permute.xlu0 %15  }
  0x76   :  { %18 = vst.msk [vmem:[#allocation0] sm:$0x3] %vm17_vm2, %v16_v22   ;;  %20 = vst.msk [vmem:[#allocation0 + $0x6] sm:$0xc] %vm17_vm2, %v16_v22  }
  0x77   :  { %v44_v23 = vpop.permute.xlu1 %43  }
  0x79   :  { %v30_v24 = vpop.permute.xlu0 %29  }
  0x7a   :  { %32 = vst.msk [vmem:[#allocation0] sm:$0x3] %vm31_vm3, %v30_v24   ;;  %34 = vst.msk [vmem:[#allocation0 + $0x6] sm:$0xc] %vm31_vm3, %v30_v24  }
  0x7b   :  { %46 = vst.msk [vmem:[#allocation0] sm:$0x3] %vm45_vm4, %v44_v23   ;;  %48 = vst.msk [vmem:[#allocation0 + $0x6] sm:$0xc] %vm45_vm4, %v44_v23   ;;  %v58_v25 = vpop.permute.xlu1 %57  }
  0x7c   :  { %60 = vst.msk [vmem:[#allocation0] sm:$0x3] %vm59_vm5, %v58_v25   ;;  %62 = vst.msk [vmem:[#allocation0 + $0x6] sm:$0xc] %vm59_vm5, %v58_v25  }
  0x7d   :  { %v72_v26 = vpop.permute.xlu0 %71  }
  0x7e   :  { %74 = vst.msk [vmem:[#allocation0] sm:$0x3] %vm73_vm6, %v72_v26   ;;  %76 = vst.msk [vmem:[#allocation0 + $0x6] sm:$0xc] %vm73_vm6, %v72_v26  }
  0x7f   :  { %v86_v27 = vpop.permute.xlu1 %85  }
  0x80   :  { %88 = vst.msk [vmem:[#allocation0] sm:$0x3] %vm87_vm7, %v86_v27   ;;  %90 = vst.msk [vmem:[#allocation0 + $0x6] sm:$0xc] %vm87_vm7, %v86_v27  }
  0x81   :  { %v100_v28 = vpop.permute.xlu0 %99  }
  0x82   :  { %102 = vst.msk [vmem:[#allocation0] sm:$0x3] %vm101_vm8, %v100_v28   ;;  %104 = vst.msk [vmem:[#allocation0 + $0x6] sm:$0xc] %vm101_vm8, %v100_v28  }
  0x89   :  { %v108_v29 = vld [vmem:[#allocation0] sm:$0x3]  ;;  %v112_v30 = vld [vmem:[#allocation0 + $0x8] sm:$0x3] }
  0x8a   :  { %110 = vst [vmem:[%s214_s1] sm:$0x3] %v108_v29  ;;  %130 = vst [vmem:[%s214_s1 + $0x2] sm:$0x3] %v112_v30 }

// kernel: tile.26
= control target key start
LH: loop header
LB: loop body
LE: loop exit
PB: predicated region body
PF: predicated region fallthrough
CT: control target
= control target key end

     0   :  { %s28_s0 = inlined_call_operand.vmem [shape: f32[16], index: 0, kind: input, shape index: {}]   ;;  %s29_s1 = inlined_call_operand.vmem [shape: f32[16,16], index: 1, kind: output, shape index: {}]  }
   0x1   :  { %v4_v0 = vld [vmem:[%s28_s0] ss:$0 sm:$0xff] }
   0x2   :  { %5 = vst [vmem:[%s29_s1] sm:$0xff] %v4_v0  ;;  %8 = vst [vmem:[%s29_s1 + $0x8] sm:$0xff] %v4_v0 }

// kernel: tile.27
= control target key start
LH: loop header
LB: loop body
LE: loop exit
PB: predicated region body
PF: predicated region fallthrough
CT: control target
= control target key end

     0   :  { %s7_s6 = smov 3  ;;  %s21_s9 = smov 3  ;;  %vm4_vm0 = vcmask 130048   ;;  %vm11_vm1 = vcmask 1048448   ;;  %vm18_vm2 = vcmask 917248   ;;  %vm25_vm3 = vcmask 786048   ;;  %s128_s0 = inlined_call_operand.vmem [shape: f32[16,16], index: 0, kind: input, shape index: {}]   ;;  %s129_s1 = inlined_call_operand.vmem [shape: f32[1,256], index: 1, kind: output, shape index: {}]  }
   0x1   :  { %v66_v0 = vld [vmem:[%s128_s0 + $0x7] ss:$8 sm:%s7_s6]   ;;  %s81_s10 = smov 112   ;;  %v68_v1 = vld [vmem:[%s128_s0 + $0x5] ss:$8 sm:%s21_s9]   ;;  %s14_s13 = smov 3 }
   0x2   :  { %9 = vrot.lane.b32.xlu0 %v66_v0, %s81_s10  ;;  %s82_s14 = smov 80   ;;  %v67_v2 = vld [vmem:[%s128_s0 + $0x6] ss:$8 sm:%s14_s13]   ;;  %s28_s17 = smov 3  ;;  %vm32_vm4 = vcmask 654848   ;;  %vm39_vm5 = vcmask 523648  }
   0x3   :  { %23 = vrot.lane.b32.xlu1 %v68_v1, %s82_s14  ;;  %v69_v3 = vld [vmem:[%s128_s0 + $0x4] ss:$8 sm:%s28_s17]   ;;  %s35_s20 = smov 3  ;;  %s42_s21 = smov 3  ;;  %vm46_vm6 = vcmask 392448   ;;  %vm53_vm7 = vcmask 261248  }
   0x4   :  { %s83_s22 = smov 96   ;;  %s84_s23 = smov 64   ;;  %v70_v4 = vld [vmem:[%s128_s0 + $0x3] ss:$8 sm:%s35_s20]   ;;  %v71_v5 = vld [vmem:[%s128_s0 + $0x2] ss:$8 sm:%s42_s21]  }
   0x5   :  { %s2_s26 = smov 3  ;;  %s49_s29 = smov 3 }
   0x6   :  { %16 = vrot.lane.b32.xlu0 %v67_v2, %s83_s22  ;;  %v3_v6 = vld [vmem:[%s128_s0] ss:$8 sm:%s2_s26]   ;;  %s85_s3 = smov 48   ;;  %s86_s4 = smov 32  }
   0x7   :  { %30 = vrot.lane.b32.xlu1 %v69_v3, %s84_s23  ;;  %5 = vst.msk [vmem:[#allocation0] ss:$8 sm:$0x3] %vm4_vm0, %v3_v6   ;;  %v72_v7 = vld [vmem:[%s128_s0 + $0x1] ss:$8 sm:%s49_s29]   ;;  %s87_s0 = smov 16  }
   0xa   :  { %37 = vrot.lane.b32.xlu0 %v70_v4, %s85_s3 }
   0xb   :  { %44 = vrot.lane.b32.xlu1 %v71_v5, %s86_s4 }
   0xe   :  { %51 = vrot.lane.b32.xlu0 %v72_v7, %s87_s0 }
  0x74   :  { %v10_v8 = vpop.permute.xlu0 %9  }
  0x75   :  { %12 = vst.msk [vmem:[#allocation0] ss:$8 sm:$0x3] %vm11_vm1, %v10_v8   ;;  %v24_v9 = vpop.permute.xlu1 %23  }
  0x78   :  { %v17_v10 = vpop.permute.xlu0 %16  }
  0x79   :  { %19 = vst.msk [vmem:[#allocation0] ss:$8 sm:$0x3] %vm18_vm2, %v17_v10   ;;  %v31_v11 = vpop.permute.xlu1 %30  }
  0x7a   :  { %26 = vst.msk [vmem:[#allocation0] ss:$8 sm:$0x3] %vm25_vm3, %v24_v9  }
  0x7b   :  { %33 = vst.msk [vmem:[#allocation0] ss:$8 sm:$0x3] %vm32_vm4, %v31_v11  }
  0x7c   :  { %v38_v12 = vpop.permute.xlu0 %37  }
  0x7d   :  { %40 = vst.msk [vmem:[#allocation0] ss:$8 sm:$0x3] %vm39_vm5, %v38_v12   ;;  %v45_v13 = vpop.permute.xlu1 %44  }
  0x7e   :  { %47 = vst.msk [vmem:[#allocation0] ss:$8 sm:$0x3] %vm46_vm6, %v45_v13  }
  0x80   :  { %v52_v14 = vpop.permute.xlu0 %51  }
  0x81   :  { %54 = vst.msk [vmem:[#allocation0] ss:$8 sm:$0x3] %vm53_vm7, %v52_v14  }
  0x88   :  { %v58_v15 = vld [vmem:[#allocation0] sm:$0x1]  ;;  %v62_v16 = vld [vmem:[#allocation0 + $0x8] sm:$0x1] }
  0x89   :  { %60 = vst [vmem:[%s129_s1] sm:$0x1] %v58_v15  ;;  %73 = vst [vmem:[%s129_s1 + $0x1] sm:$0x1] %v62_v16 }

// kernel: block_forward.1
= control target key start
LH: loop header
LB: loop body
LE: loop exit
PB: predicated region body
PF: predicated region fallthrough
CT: control target
= control target key end

     0   :  { %v1362_v1 = vmov 0   ;;  %vm170_vm0 = vsmask.f32 3328  ;;  %vm110_vm1 = vcmask 1043456   ;;  %vm171_vm2 = vsmask.f32 7440  ;;  %s1824_s1 = inlined_call_operand.vmem [shape: bf16[3,72,256], index: 1, kind: input, shape index: {}]   ;;  %s1825_s0 = inlined_call_operand.vmem [shape: bf16[2,18,72], index: 0, kind: input, shape index: {}]   ;;  %s1826_s5 = inlined_call_operand.vmem [shape: f32[256,8], index: 5, kind: input, shape index: {}]   ;;  %s1827_s2 = inlined_call_operand.vmem [shape: f32[1,256], index: 2, kind: input, shape index: {}]   ;;  %s1828_s6 = inlined_call_operand.vmem [shape: f32[8,256], index: 6, kind: input, shape index: {}]   ;;  %s1829_s7 = inlined_call_operand.vmem [shape: f32[2,256], index: 7, kind: input, shape index: {}]   ;;  %s1830_s3 = inlined_call_operand.vmem [shape: f32[1,256], index: 3, kind: input, shape index: {}]   ;;  %s1831_s4 = inlined_call_operand.vmem [shape: f32[1,256], index: 4, kind: input, shape index: {}]   ;;  %s1832_s8 = inlined_call_operand.vmem [shape: f32[2,256], index: 8, kind: input, shape index: {}]   ;;  %s1833_s9 = inlined_call_operand.vmem [shape: f32[2,16,256], index: 9, kind: output, shape index: {}]  }
   0x1   :  { %v1284_v0 = vld [vmem:[%s1824_s1 + $0x4c] ss:$8 sps:$4 sm:$0xff]   ;;  %326 = vmatprep.mubr.bf16.mxu0 %v1362_v1  ;;  %149 = vmatprep.mubr.bf16.mxu1 %v1362_v1  ;;  %v1286_v2 = vld [vmem:[%s1824_s1 + $0x48] ss:$8 sps:$4 sm:$0xff]   ;;  %v1287_v3 = vld [vmem:[%s1824_s1 + $0x5c] ss:$8 sps:$4 sm:$0xff]  }
   0x2   :  { %294 = vmatprep.subr.bf16.mxu0 %v1284_v0  ;;  %v1289_v4 = vld [vmem:[%s1824_s1 + $0x58] ss:$8 sps:$4 sm:$0xff]   ;;  %v1290_v5 = vld [vmem:[%s1824_s1 + $0x6c] ss:$8 sps:$4 sm:$0xff]   ;;  %v1292_v6 = vld [vmem:[%s1824_s1 + $0x68] ss:$8 sps:$4 sm:$0xff]  }
   0x3   :  { %295 = vmatpush1.bf16.msra.mxu0 %v1286_v2  ;;  %v1297_v7 = vld [vmem:[%s1824_s1 + $0x4] ss:$8 sps:$4 sm:$0xff]   ;;  %v1300_v8 = vld [vmem:[%s1824_s1] ss:$8 sps:$4 sm:$0xff]   ;;  %v1304_v11 = vld [vmem:[%s1824_s1 + $0x14] ss:$8 sps:$4 sm:$0xff]  }
   0x4   :  { %296 = vmatprep.subr.bf16.mxu0 %v1287_v3  ;;  %v1293_v9 = vld [vmem:[%s1824_s1 + $0x7c] ss:$8 sps:$4 sm:$0xff]   ;;  %v1145_v10 = vld [vmem:[%s1824_s1 + $0x88] sm:$0xff]  ;;  %117 = vmatprep.subr.bf16.mxu1 %v1297_v7  ;;  %v1454_v12 = vld [vmem:[%s1825_s0] sm:$0xf]  ;;  %vm103_vm3 = vcmask 588800  }
   0x5   :  { %118 = vmatpush1.bf16.msra.mxu1 %v1300_v8  ;;  %v1459_v13 = vld [vmem:[%s1825_s0 + $0x4] sm:$0xf]  ;;  %v1464_v14 = vld [vmem:[%s1825_s0 + $0x8] sm:$0x1]  ;;  %v174_v15 = vshrl.u32 %v1454_v12, 16  ;;  %v177_v16 = vshll.u32 %v1454_v12, 16  ;;  %v1157_v20 = vcombine.high %v1145_v10, %v1145_v10  ;;  %v1156_v21 = vcombine.low %v1145_v10, %v1145_v10  ;;  %vm1489_vm4 = vmor %vm170_vm0, %vm171_vm2 }
   0x6   :  { %v183_v17 = vshll.u32 %v1459_v13, 16  ;;  %v187_v18 = vshrl.u32 %v1459_v13, 16  ;;  %v1295_v19 = vld [vmem:[%s1824_s1 + $0x78] ss:$8 sps:$4 sm:$0xff]   ;;  %119 = vmatprep.subr.bf16.mxu1 %v1304_v11  ;;  %v193_v22 = vshll.u32 %v1464_v14, 16  ;;  %v362_v7 = vrot.slane %v1459_v13, 5 }
   0x7   :  { %297 = vmatpush1.bf16.msra.mxu0 %v1289_v4  ;;  %v1306_v23 = vld [vmem:[%s1824_s1 + $0x10] ss:$8 sps:$4 sm:$0xff]   ;;  %v176_v24 = vrot.slane %v174_v15, 4  ;;  %v179_v25 = vrot.slane %v177_v16, 5  ;;  %v1310_v31 = vld [vmem:[%s1824_s1 + $0x24] ss:$8 sps:$4 sm:$0xff]   ;;  %v1122_v4 = vcombine.low %v1454_v12, %v1459_v13 }
   0x8   :  { %298 = vmatprep.subr.bf16.mxu0 %v1290_v5  ;;  %v185_v26 = vrot.slane %v183_v17, 5  ;;  %v189_v27 = vrot.slane %v187_v18, 4  ;;  %v195_v30 = vrot.slane %v193_v22, 5  ;;  %v1312_v32 = vld [vmem:[%s1824_s1 + $0x20] ss:$8 sps:$4 sm:$0xff]   ;;  %v289_v33 = vsel %vm110_vm1, %v1156_v21, 0 }
   0x9   :  { %120 = vmatpush1.bf16.msra.mxu1 %v1306_v23  ;;  %v180_v28 = vor.u32 %v179_v25, %v176_v24  ;;  %v1303_v34 = vld [vmem:[%s1824_s1 + $0x94] ss:$8 sps:$4 sm:$0xff]   ;;  %v1318_v39 = vld [vmem:[%s1824_s1 + $0x30] ss:$8 sps:$4 sm:$0xff]   ;;  %v1503_v40 = vld [vmem:[%s1825_s0 + $0xc] sm:$0xf] }
   0xa   :  { %v190_v29 = vor.u32 %v189_v27, %v185_v26  ;;  %121 = vmatprep.subr.bf16.mxu1 %v1310_v31  ;;  %v1316_v38 = vld [vmem:[%s1824_s1 + $0x34] ss:$8 sps:$4 sm:$0xff]   ;;  %v1508_v41 = vld [vmem:[%s1825_s0 + $0x10] sm:$0xf]  ;;  %v198_v45 = vshrl.u32 %v1503_v40, 16  ;;  %v201_v46 = vshll.u32 %v1503_v40, 16 }
   0xb   :  { %299 = vmatpush1.bf16.msra.mxu0 %v1292_v6  ;;  %v181_v36 = vrot.slane %v180_v28, 4  ;;  %v1517_v44 = vld [vmem:[%s1825_s0 + $0x14] sm:$0x1]  ;;  %v1301_v47 = vld [vmem:[%s1824_s1 + $0x90] ss:$8 sps:$4 sm:$0xff]   ;;  %v207_v49 = vshll.u32 %v1508_v41, 16 }
   0xc   :  { %300 = vmatprep.subr.bf16.mxu0 %v1293_v9  ;;  %v191_v37 = vrot.slane %v190_v29, 4  ;;  %v211_v50 = vshrl.u32 %v1508_v41, 16  ;;  %v217_v51 = vshll.u32 %v1517_v44, 16  ;;  %v47_v52 = vld [vmem:[%s1824_s1 + $0x40] sm:$0xff]  ;;  %v200_v54 = vrot.slane %v198_v45, 4  ;;  %v1171_v13 = vld [vmem:[%s1824_s1 + $0xd0] sm:$0xff] }
   0xd   :  { %122 = vmatpush1.bf16.msra.mxu1 %v1312_v32  ;;  %v186_v42 = vsel %vm1489_vm4, %v181_v36, %v185_v26  ;;  %v1309_v53 = vld [vmem:[%s1824_s1 + $0xa4] ss:$8 sps:$4 sm:$0xff]   ;;  %v203_v55 = vrot.slane %v201_v46, 5  ;;  %v1133_v56 = vcombine.high %v47_v52, %v47_v52  ;;  %v1132_v57 = vcombine.low %v47_v52, %v47_v52  ;;  %v1307_v62 = vld [vmem:[%s1824_s1 + $0xa0] ss:$8 sps:$4 sm:$0xff]   ;;  %v672_v52 = vld [vmem:[%s1826_s5 + $0x30] sm:$0xff] }
   0xe   :  { %v196_v43 = vsel %vm1489_vm4, %v191_v37, %v195_v30  ;;  %123 = vmatprep.subr.bf16.mxu1 %v1316_v38  ;;  %v209_v58 = vrot.slane %v207_v49, 5  ;;  %v213_v59 = vrot.slane %v211_v50, 4  ;;  %v219_v0 = vrot.slane %v217_v51, 5  ;;  %v1315_v2 = vld [vmem:[%s1824_s1 + $0xb4] ss:$8 sps:$4 sm:$0xff]   ;;  %v682_v32 = vld [vmem:[%s1826_s5 + $0x80] sm:$0xff] }
   0xf   :  { %301 = vmatpush1.bf16.msra.mxu0 %v1295_v19  ;;  %v1146_v48 = vcombine.low %v186_v42, %v196_v43  ;;  %v204_v60 = vor.u32 %v203_v55, %v200_v54  ;;  %v112_v61 = vsel %vm110_vm1, %v1132_v57, 0  ;;  %v1313_v8 = vld [vmem:[%s1824_s1 + $0xb0] ss:$8 sps:$4 sm:$0xff]   ;;  %v1321_v11 = vld [vmem:[%s1824_s1 + $0xc4] ss:$8 sps:$4 sm:$0xff]   ;;  %vm357_vm5 = vcmask 1042432  }
  0x10   :  { %1158 = vmatprep.subr.msk.bf16.mxu0 %vm110_vm1, %v1157_v20  ;;  %v214_v63 = vor.u32 %v213_v59, %v209_v58  ;;  %vm358_vm6 = vcmask 1046532   ;;  %v365_v15 = vrot.slane %v1464_v14, 5  ;;  %v1319_v16 = vld [vmem:[%s1824_s1 + $0xc0] ss:$8 sps:$4 sm:$0xff]   ;;  %v1161_v17 = vrot.slane %v1454_v12, 9  ;;  %v684_v37 = vld [vmem:[%s1826_s5 + $0x90] sm:$0xff] }
  0x11   :  { %124 = vmatpush1.bf16.msra.mxu1 %v1318_v39  ;;  %v205_v3 = vrot.slane %v204_v60, 4  ;;  %v364_v18 = vrot.slane %v362_v7, 4  ;;  %v1183_v19 = vcombine.high %v1171_v13, %v1171_v13  ;;  %v1182_v20 = vcombine.low %v1171_v13, %v1171_v13  ;;  %vm1568_vm7 = vmor %vm357_vm5, %vm358_vm6  ;;  %v667_v35 = vld [vmem:[%s1826_s5 + $0x8] sm:$0xff]  ;;  %v685_v38 = vld [vmem:[%s1826_s5 + $0x98] sm:$0xff] }
  0x12   :  { %1134 = vmatprep.subr.msk.bf16.mxu1 %vm110_vm1, %v1133_v56  ;;  %v215_v5 = vrot.slane %v214_v63, 4  ;;  %v1123_v14 = vcombine.low %v1503_v40, %v1508_v41  ;;  %v363_v22 = vsel %vm1568_vm7, %v1161_v17, %v362_v7  ;;  %v369_v12 = vrot.slane %v1508_v41, 5  ;;  %v669_v41 = vld [vmem:[%s1826_s5 + $0x18] sm:$0xff]  ;;  %v686_v43 = vld [vmem:[%s1826_s5 + $0xa0] sm:$0xff]  ;;  %v688_v49 = vld [vmem:[%s1826_s5 + $0xb0] sm:$0xff] }
  0x13   :  { %303 = vmatpush1.bf16.msra.mxu0 %v289_v33  ;;  %v210_v6 = vsel %vm1489_vm4, %v205_v3, %v209_v58  ;;  %v366_v23 = vsel %vm1568_vm7, %v364_v18, %v365_v15  ;;  %v442_v24 = vsel %vm110_vm1, %v1182_v20, 0  ;;  %v1162_v26 = vrot.slane %v1503_v40, 9  ;;  %v683_v33 = vld [vmem:[%s1826_s5 + $0x88] sm:$0xff]  ;;  %v668_v40 = vld [vmem:[%s1826_s5 + $0x10] sm:$0xff]  ;;  %v670_v46 = vld [vmem:[%s1826_s5 + $0x20] sm:$0xff] }
  0x14   :  { %447 = vmatprep.subr.bf16.mxu0 %v1303_v34  ;;  %v220_v9 = vsel %vm1489_vm4, %v215_v5, %v219_v0  ;;  %v1172_v25 = vcombine.low %v363_v22, %v366_v23  ;;  %v371_v27 = vrot.slane %v369_v12, 4  ;;  %v372_v28 = vrot.slane %v1517_v44, 5  ;;  %v687_v44 = vld [vmem:[%s1826_s5 + $0xa8] sm:$0xff]  ;;  %v689_v50 = vld [vmem:[%s1826_s5 + $0xb8] sm:$0xff]  ;;  %v690_v55 = vld [vmem:[%s1826_s5 + $0xc0] sm:$0xff] }
  0x15   :  { %126 = vmatpush1.bf16.msra.mxu1 %v112_v61  ;;  %v1147_v10 = vcombine.low %v210_v6, %v220_v9  ;;  %v370_v29 = vsel %vm1568_vm7, %v1162_v26, %v369_v12  ;;  %v1232_v34 = vpack.c.bf16 %v683_v33, %v682_v32  ;;  %v1236_v39 = vpack.c.bf16 %v685_v38, %v684_v37  ;;  %v691_v56 = vld [vmem:[%s1826_s5 + $0xc8] sm:$0xff]  ;;  %v674_v58 = vld [vmem:[%s1826_s5 + $0x40] sm:$0xff]  ;;  %v692_v61 = vld [vmem:[%s1826_s5 + $0xd0] sm:$0xff] }
  0x16   :  { %1159 = vmatmul.mubr.msk.bf16.vlgmr.msra.gmra.mrb[0].mxu0 %vm103_vm3, %v1146_v48  ;;  %v373_v30 = vsel %vm1568_vm7, %v371_v27, %v372_v28  ;;  %v1238_v42 = vpack.c.bf16 %v669_v41, %v668_v40  ;;  %v1240_v45 = vpack.c.bf16 %v687_v44, %v686_v43  ;;  %v1244_v51 = vpack.c.bf16 %v689_v50, %v688_v49  ;;  %v675_v59 = vld [vmem:[%s1826_s5 + $0x48] sm:$0xff]  ;;  %v676_v63 = vld [vmem:[%s1826_s5 + $0x50] sm:$0xff]  ;;  %v694_v3 = vld [vmem:[%s1826_s5 + $0xe0] sm:$0xff] }
  0x17   :  { %448 = vmatpush1.bf16.msra.mxu0 %v1301_v47  ;;  %336 = vmatprep.mubr.bf16.mxu0 %v1362_v1  ;;  %v1173_v31 = vcombine.low %v370_v29, %v373_v30  ;;  %v671_v47 = vld [vmem:[%s1826_s5 + $0x28] sm:$0xff]  ;;  %v1248_v57 = vpack.c.bf16 %v691_v56, %v690_v55  ;;  %v1250_v60 = vpack.c.bf16 %v675_v59, %v674_v58  ;;  %v678_v7 = vld [vmem:[%s1826_s5 + $0x60] sm:$0xff]  ;;  %v696_v9 = vld [vmem:[%s1826_s5 + $0xf0] sm:$0xff]  ;;  %vm589_vm8 = vcmask 1041409  }
  0x18   :  { %449 = vmatprep.subr.bf16.mxu0 %v1309_v53  ;;  %1135 = vmatmul.mubr.msk.bf16.vlgmr.msra.gmra.mrb[0].mxu1 %vm103_vm3, %v1122_v4  ;;  %v1242_v48 = vpack.c.bf16 %v671_v47, %v670_v46  ;;  %v673_v53 = vld [vmem:[%s1826_s5 + $0x38] sm:$0xff]  ;;  %v695_v4 = vld [vmem:[%s1826_s5 + $0xe8] sm:$0xff]  ;;  %v680_v15 = vld [vmem:[%s1826_s5 + $0x70] sm:$0xff]  ;;  %vm656_vm9 = vcmask 1043459   ;;  %vm663_vm10 = vcmask 1041408   ;;  %vm780_vm11 = vcmask 64512  }
  0x19   :  { %159 = vmatprep.mubr.bf16.mxu1 %v1362_v1  ;;  %1233 = vmatprep.subr.bf16.mxu1 %v1232_v34  ;;  %v1246_v54 = vpack.c.bf16 %v673_v53, %v672_v52  ;;  %v1256_v6 = vpack.c.bf16 %v695_v4, %v694_v3  ;;  %v575_v52 = vlaneseq }
  0x1b   :  { %450 = vmatpush1.bf16.msra.mxu0 %v1307_v62  ;;  %v693_v62 = vld [vmem:[%s1826_s5 + $0xd8] sm:$0xff]  ;;  %v1727_v3 = vshrl.u32 %v575_v52, 7 }
  0x1c   :  { %451 = vmatprep.subr.bf16.mxu0 %v1315_v2  ;;  %v1252_v0 = vpack.c.bf16 %v693_v62, %v692_v61  ;;  %v677_v2 = vld [vmem:[%s1826_s5 + $0x58] sm:$0xff] }
  0x1d   :  { %v1254_v5 = vpack.c.bf16 %v677_v2, %v676_v63 }
  0x1e   :  { %1160 = vmatmul.mubr.msk.bf16.gmra.mrb[4].mxu0 %vm103_vm3, %v1147_v10  ;;  %v697_v10 = vld [vmem:[%s1826_s5 + $0xf8] sm:$0xff] }
  0x1f   :  { %452 = vmatpush1.bf16.msra.mxu0 %v1313_v8  ;;  %479 = vmatprep.mubr.bf16.mxu0 %v1362_v1  ;;  %v679_v8 = vld [vmem:[%s1826_s5 + $0x68] sm:$0xff]  ;;  %v1260_v13 = vpack.c.bf16 %v697_v10, %v696_v9 }
  0x20   :  { %453 = vmatprep.subr.bf16.mxu0 %v1321_v11  ;;  %1136 = vmatmul.mubr.msk.bf16.gmra.mrb[4].mxu1 %vm103_vm3, %v1123_v14  ;;  %v1258_v11 = vpack.c.bf16 %v679_v8, %v678_v7 }
  0x23   :  { %454 = vmatpush1.bf16.msra.mxu0 %v1319_v16  ;;  %v681_v16 = vld [vmem:[%s1826_s5 + $0x78] sm:$0xff] }
  0x24   :  { %1184 = vmatprep.subr.msk.bf16.mxu0 %vm110_vm1, %v1183_v19  ;;  %v1262_v17 = vpack.c.bf16 %v681_v16, %v680_v15 }
  0x27   :  { %456 = vmatpush1.bf16.msra.mxu0 %v442_v24 }
  0x2a   :  { %1185 = vmatmul.mubr.msk.bf16.vlgmr.msra.gmra.mrb[0].mxu0 %vm103_vm3, %v1172_v25 }
  0x2b   :  { %489 = vmatprep.mubr.bf16.mxu0 %v1362_v1  ;;  %v666_v1 = vld [vmem:[%s1826_s5] sm:$0xff] }
  0x2c   :  { %v1234_v36 = vpack.c.bf16 %v667_v35, %v666_v1 }
  0x2e   :  { %1235 = vmatpush3.bf16.msra.mxu1 %v1234_v36 }
  0x2f   :  { %1237 = vmatprep.subr.bf16.mxu1 %v1236_v39 }
  0x32   :  { %1186 = vmatmul.mubr.msk.bf16.gmra.mrb[4].mxu0 %vm103_vm3, %v1173_v31  ;;  %1239 = vmatpush3.bf16.msra.mxu1 %v1238_v42 }
  0x33   :  { %1241 = vmatprep.subr.bf16.mxu1 %v1240_v45 }
  0x36   :  { %1243 = vmatpush3.bf16.msra.mxu1 %v1242_v48 }
  0x37   :  { %1245 = vmatprep.subr.bf16.mxu1 %v1244_v51 }
  0x3a   :  { %1247 = vmatpush3.bf16.msra.mxu1 %v1246_v54 }
  0x3b   :  { %1249 = vmatprep.subr.bf16.mxu1 %v1248_v57 }
  0x3e   :  { %1251 = vmatpush3.bf16.msra.mxu1 %v1250_v60 }
  0x3f   :  { %1253 = vmatprep.subr.bf16.mxu1 %v1252_v0 }
  0x42   :  { %1255 = vmatpush3.bf16.msra.mxu1 %v1254_v5 }
  0x43   :  { %1257 = vmatprep.subr.bf16.mxu1 %v1256_v6 }
  0x46   :  { %1259 = vmatpush3.bf16.msra.mxu1 %v1258_v11  ;;  %v1732_v11 = vld [vmem:[%s1827_s2] sm:$0x3] }
  0x47   :  { %1261 = vmatprep.subr.bf16.mxu1 %v1260_v13 }
  0x4a   :  { %1263 = vmatpush3.bf16.msra.mxu1 %v1262_v17 }
  0xeb   :  { %v151_v18 = vpop.f32.mrb[0].mxu1 }
  0xec   :  { %v153_v19 = vpop.f32.mrb[1].mxu1 }
  0xed   :  { %v155_v20 = vpop.f32.mrb[2].mxu1 }
  0xee   :  { %v157_v21 = vpop.f32.mrb[3].mxu1 }
  0xf3   :  { %v161_v14 = vpop.f32.mrb[4].mxu1 }
  0xf4   :  { %v163_v22 = vpop.f32.mrb[5].mxu1 }
  0xf5   :  { %v165_v23 = vpop.f32.mrb[6].mxu1 }
  0xf6   :  { %v167_v12 = vpop.f32.mrb[7].mxu1 }
  0xfd   :  { %v481_v24 = vpop.f32.mrb[0].mxu0 }
  0xfe   :  { %v1687_v25 = vadd.f32 %v481_v24, %v151_v18  ;;  %v483_v26 = vpop.f32.mrb[1].mxu0 }
  0xff   :  { %v1689_v27 = vadd.f32 %v483_v26, %v153_v19  ;;  %v485_v28 = vpop.f32.mrb[2].mxu0  ;;  %v573_v19 = vmul.f32 2.0, %v1732_v11 }
 0x100   :  { %v1691_v29 = vadd.f32 %v485_v28, %v155_v20  ;;  %v487_v30 = vpop.f32.mrb[3].mxu0  ;;  %v537_v32 = vmul.f32 %v1687_v25, %v1687_v25  ;;  %v1736_v20 = vsub.s32 0, %v1727_v3 }
 0x101   :  { %v1693_v31 = vadd.f32 %v487_v30, %v157_v21  ;;  %v538_v1 = vmul.f32 %v1689_v27, %v1689_v27 }
 0x102   :  { %v509_v33 = vadd.f32 %v1691_v29, %v1687_v25  ;;  %v539_v34 = vmul.f32 %v1691_v29, %v1691_v29 }
 0x103   :  { %v516_v35 = vadd.f32 %v1693_v31, %v1689_v27  ;;  %v540_v36 = vmul.f32 %v1693_v31, %v1693_v31 }
 0x104   :  { %v510_v37 = vrot.slane %v509_v33, 4  ;;  %v545_v38 = vadd.f32 %v539_v34, %v537_v32  ;;  %v1740_v34 = vsub.s32 1, %v1727_v3 }
 0x105   :  { %v517_v39 = vrot.slane %v516_v35, 4  ;;  %v552_v40 = vadd.f32 %v540_v36, %v538_v1  ;;  %v491_v41 = vpop.f32.mrb[4].mxu0  ;;  %v578_v36 = vrot.slane %v573_v19, %v1736_v20 }
 0x106   :  { %v511_v42 = vadd.f32 %v510_v37, %v509_v33  ;;  %v546_v43 = vrot.slane %v545_v38, 4  ;;  %v1707_v44 = vadd.f32 %v491_v41, %v161_v14  ;;  %v493_v45 = vpop.f32.mrb[5].mxu0 }
 0x107   :  { %v518_v46 = vadd.f32 %v517_v39, %v516_v35  ;;  %v553_v47 = vrot.slane %v552_v40, 4  ;;  %v1709_v48 = vadd.f32 %v493_v45, %v163_v22  ;;  %v495_v49 = vpop.f32.mrb[6].mxu0  ;;  %v582_v45 = vrot.slane %v573_v19, %v1740_v34 }
 0x108   :  { %v1711_v50 = vadd.f32 %v495_v49, %v165_v23  ;;  %v497_v51 = vpop.f32.mrb[7].mxu0  ;;  %v512_v53 = vrot.slane %v511_v42, 2  ;;  %v547_v54 = vadd.f32 %v546_v43, %v545_v38  ;;  %v541_v57 = vmul.f32 %v1707_v44, %v1707_v44 }
 0x109   :  { %v1713_v55 = vadd.f32 %v497_v51, %v167_v12  ;;  %v554_v56 = vadd.f32 %v553_v47, %v552_v40  ;;  %v519_v60 = vrot.slane %v518_v46, 2  ;;  %v542_v61 = vmul.f32 %v1709_v48, %v1709_v48 }
 0x10a   :  { %v523_v58 = vadd.f32 %v1711_v50, %v1707_v44  ;;  %v543_v59 = vmul.f32 %v1711_v50, %v1711_v50  ;;  %v548_v4 = vrot.slane %v547_v54, 2  ;;  %v513_v7 = vadd.f32 %v512_v53, %v511_v42 }
 0x10b   :  { %v530_v62 = vadd.f32 %v1713_v55, %v1709_v48  ;;  %v544_v63 = vmul.f32 %v1713_v55, %v1713_v55  ;;  %v555_v8 = vrot.slane %v554_v56, 2  ;;  %v520_v13 = vadd.f32 %v519_v60, %v518_v46 }
 0x10c   :  { %v524_v0 = vrot.slane %v523_v58, 4  ;;  %v559_v2 = vadd.f32 %v543_v59, %v541_v57  ;;  %v549_v21 = vadd.f32 %v548_v4, %v547_v54  ;;  %v608_v23 = vmul.f32 16.0, %v1732_v11 }
 0x10d   :  { %v531_v5 = vrot.slane %v530_v62, 4  ;;  %v566_v6 = vadd.f32 %v544_v63, %v542_v61  ;;  %v514_v12 = vrot.slane %v513_v7, 1  ;;  %v556_v24 = vadd.f32 %v555_v8, %v554_v56 }
 0x10e   :  { %v525_v9 = vadd.f32 %v524_v0, %v523_v58  ;;  %v560_v10 = vrot.slane %v559_v2, 4  ;;  %v521_v30 = vrot.slane %v520_v13, 1  ;;  %v550_v37 = vrot.slane %v549_v21, 1 }
 0x10f   :  { %v532_v15 = vadd.f32 %v531_v5, %v530_v62  ;;  %v567_v16 = vrot.slane %v566_v6, 4  ;;  %v609_v40 = vmul.f32 %v608_v23, %v1732_v11  ;;  %v515_v41 = vadd.f32 %v514_v12, %v513_v7 }
 0x110   :  { %v526_v17 = vrot.slane %v525_v9, 2  ;;  %v561_v18 = vadd.f32 %v560_v10, %v559_v2  ;;  %v557_v42 = vrot.slane %v556_v24, 1  ;;  %v522_v47 = vadd.f32 %v521_v30, %v520_v13 }
 0x111   :  { %v533_v14 = vrot.slane %v532_v15, 2  ;;  %v568_v22 = vadd.f32 %v567_v16, %v566_v6  ;;  %v551_v53 = vadd.f32 %v550_v37, %v549_v21  ;;  %v614_v57 = vrot.slane %v609_v40, %v1736_v20 }
 0x112   :  { %v527_v26 = vadd.f32 %v526_v17, %v525_v9  ;;  %v562_v28 = vrot.slane %v561_v18, 2  ;;  %v558_v58 = vadd.f32 %v557_v42, %v556_v24  ;;  %v618_v60 = vrot.slane %v609_v40, %v1740_v34 }
 0x113   :  { %v534_v32 = vadd.f32 %v533_v14, %v532_v15  ;;  %v569_v33 = vrot.slane %v568_v22, 2  ;;  %v633_v61 = vrot.slane %v608_v23, %v1740_v34  ;;  %v629_v2 = vrot.slane %v608_v23, %v1736_v20 }
 0x114   :  { %v528_v1 = vrot.slane %v527_v26, 1  ;;  %v563_v35 = vadd.f32 %v562_v28, %v561_v18  ;;  %v1363_v37 = vmov 0.0  }
 0x115   :  { %v535_v38 = vrot.slane %v534_v32, 1  ;;  %v570_v39 = vadd.f32 %v569_v33, %v568_v22  ;;  %v637_v22 = vadd.f32 %v633_v61, %v522_v47  ;;  %v636_v23 = vadd.f32 %v629_v2, %v515_v41 }
 0x116   :  { %v529_v43 = vadd.f32 %v528_v1, %v527_v26  ;;  %v564_v46 = vrot.slane %v563_v35, 1 }
 0x117   :  { %v536_v49 = vadd.f32 %v535_v38, %v534_v32  ;;  %v571_v51 = vrot.slane %v570_v39, 1 }
 0x118   :  { %v590_v52 = vsel %vm589_vm8, %v529_v43, %v515_v41  ;;  %v565_v62 = vadd.f32 %v564_v46, %v563_v35  ;;  %v638_v10 = vadd.f32 %v629_v2, %v529_v43  ;;  %v779_v35 = vld [vmem:[%s1828_s6 + $0x8] sm:$0xff]  ;;  %v869_v2 = vld [vmem:[%s1831_s4] sm:$0x3] }
 0x119   :  { %v591_v54 = vsel %vm589_vm8, %v536_v49, %v522_v47  ;;  %v594_v56 = vmul.f32 %v590_v52, %v578_v36  ;;  %v572_v4 = vadd.f32 %v571_v51, %v570_v39  ;;  %v639_v7 = vadd.f32 %v633_v61, %v536_v49  ;;  %784 = vmatprep.subr.mxu1 %v779_v35  ;;  %v778_v36 = vld [vmem:[%s1828_s6] sm:$0xff] }
 0x11a   :  { %v595_v59 = vmul.f32 %v591_v54, %v582_v45  ;;  %v644_v19 = vrot.slane %v638_v10, 7  ;;  %v1364_v51 = vmov 1983009808   ;;  %v1365_v61 = vmov 1966171168  }
 0x11b   :  { %v598_v63 = vrot.slane %v594_v56, 1  ;;  %v604_v0 = vadd.f32 %v594_v56, %v551_v53  ;;  %v646_v18 = vrot.slane %v639_v7, 7  ;;  %v909_v52 = vunpack.c.l.s4 %v1364_v51  ;;  %v904_v53 = vld [vmem:[%s1829_s7] sm:$0xf] }
 0x11c   :  { %v599_v5 = vrot.slane %v595_v59, 1  ;;  %v605_v6 = vadd.f32 %v595_v59, %v558_v58  ;;  %v645_v33 = vsel %vm589_vm8, %v644_v19, %v636_v23  ;;  %v905_v54 = vadd.f32 1.0, %v904_v53  ;;  %v855_v59 = vld [vmem:[%s1830_s3] sm:$0x3] }
 0x11d   :  { %v606_v8 = vadd.f32 %v598_v63, %v565_v62  ;;  %v621_v9 = vadd.f32 %v614_v57, %v604_v0  ;;  %v647_v28 = vsel %vm589_vm8, %v646_v18, %v637_v22  ;;  %v910_v56 = vunpack.c.0.s8 %v909_v52 }
 0x11e   :  { %v607_v13 = vadd.f32 %v599_v5, %v572_v4  ;;  %v622_v15 = vadd.f32 %v618_v60, %v605_v6  ;;  %v950_v62 = vunpack.c.l.s4 %v1365_v61  ;;  %v860_v63 = vrot.slane %v855_v59, %v1736_v20 }
 0x11f   :  { %v623_v16 = vadd.f32 %v614_v57, %v606_v8  ;;  %v654_v21 = vrot.slane %v621_v9, 6  ;;  %v907_v57 = vcombine.low %v905_v54, %v905_v54  ;;  %v913_v58 = vsub.s32 %v910_v56, %v1727_v3 }
 0x120   :  { %v624_v17 = vadd.f32 %v618_v60, %v607_v13  ;;  %v658_v12 = vrot.slane %v622_v15, 6  ;;  %v864_v0 = vrot.slane %v855_v59, %v1740_v34  ;;  %v874_v4 = vrot.slane %v1732_v11, %v1736_v20 }
 0x121   :  { %v655_v14 = vrot.slane %v623_v16, 5  ;;  %v914_v60 = vrot.slane %v907_v57, %v913_v58  ;;  %v878_v6 = vrot.slane %v1732_v11, %v1740_v34  ;;  %v951_v8 = vunpack.c.0.s8 %v950_v62  ;;  %v1188_v11 = vld.sshfl [vmem:[%s1832_s8] sm:$0x33 pattern:$0x76325410] }
 0x122   :  { %v659_v24 = vrot.slane %v624_v17, 5  ;;  %v895_v13 = vrot.slane %v869_v2, %v1736_v20  ;;  %v921_v15 = vrot.slane %v905_v54, %v913_v58 }
 0x123   :  { %v657_v26 = vsel %vm656_vm9, %v655_v14, %v654_v21  ;;  %v922_v7 = vcombine.high %v914_v60, %v914_v60  ;;  %v899_v21 = vrot.slane %v869_v2, %v1740_v34 }
 0x124   :  { %v660_v30 = vsel %vm656_vm9, %v659_v24, %v658_v12  ;;  %v664_v1 = vsel %vm663_vm10, %v645_v33, %v657_v26  ;;  %v954_v24 = vsub.s32 %v951_v8, %v1727_v3 }
 0x125   :  { %v665_v32 = vsel %vm663_vm10, %v647_v28, %v660_v30  ;;  %v927_v28 = vcombine.high %v921_v15, %v921_v15 }
 0x126   :  { %762 = vmatprep.mubr.f32.mxu1 %v665_v32 }
 0x127   :  { %763 = vmatmul.mubr.f32.vlgmr.msra.gmra.mrb[8].mxu1 %v664_v1  ;;  %v941_v1 = vcombine.high %v1188_v11, %v1188_v11 }
 0x128   :  { %785 = vmatpush1.msra.mxu1 %v778_v36  ;;  %848 = vmatprep.mubr.f32.mxu1 %v1363_v37 }
 0x1fa   :  { %v1229_v38 = vpop.f32.mrb[8].mxu1 }
 0x1fb   :  { %v1230_v39 = vpop.f32.mrb[9].mxu1 }
 0x1fc   :  { %v1231_v40 = vadd.f32 %v1230_v39, %v1229_v38 }
 0x1fe   :  { %v769_v41 = vmul.f32 0.001953125, %v1231_v40 }
 0x200   :  { %v770_v42 = vmul.f32 %v769_v41, %v769_v41 }
 0x202   :  { %v772_v43 = vrot.slane %v770_v42, 6 }
 0x204   :  { %v774_v45 = vsub.f32 %v769_v41, %v772_v43 }
 0x206   :  { %v775_v46 = vadd.f32 1e-05, %v774_v45 }
 0x208   :  { %1328 = vrsqrt.f32 %v775_v46 }
 0x212   :  { %v1329_v47 = vpop.eup %1328 }
 0x213   :  { %v777_v49 = vsel %vm663_vm10, %v769_v41, %v1329_v47 }
 0x214   :  { %1187 = vmatmul.mubr.msk.f32.vlgmr.msra.gmra.mrb[10].mxu1 %vm780_vm11, %v777_v49 }
 0x2e7   :  { %v850_v5 = vpop.f32.mrb[10].mxu1 }
 0x2e8   :  { %v867_v9 = vmul.f32 %v860_v63, %v850_v5  ;;  %v852_v10 = vpop.f32.mrb[11].mxu1  ;;  %v881_v17 = vsub.f32 %v874_v4, %v850_v5 }
 0x2e9   :  { %v868_v16 = vmul.f32 %v864_v0, %v852_v10  ;;  %v882_v14 = vsub.f32 %v878_v6, %v852_v10 }
 0x2ea   :  { %v885_v18 = vrot.slane %v867_v9, 2  ;;  %v925_v19 = vmul.f32 %v914_v60, %v867_v9 }
 0x2eb   :  { %v886_v22 = vrot.slane %v868_v16, 2  ;;  %v926_v12 = vmul.f32 %v922_v7, %v868_v16 }
 0x2ec   :  { %v889_v23 = vmul.f32 %v885_v18, %v881_v17 }
 0x2ed   :  { %v890_v26 = vmul.f32 %v886_v22, %v882_v14  ;;  %v948_v30 = vcombine.low %v925_v19, %v926_v12 }
 0x2ee   :  { %v902_v32 = vadd.f32 %v895_v13, %v889_v23 }
 0x2ef   :  { %v903_v33 = vadd.f32 %v899_v21, %v890_v26  ;;  %v955_v35 = vrot.slane %v948_v30, %v954_v24 }
 0x2f0   :  { %v930_v36 = vmul.f32 %v921_v15, %v902_v32 }
 0x2f1   :  { %v931_v37 = vmul.f32 %v927_v28, %v903_v33  ;;  %v956_v38 = vcombine.high %v955_v35, %v955_v35  ;;  %v963_v39 = vrot.slane %v955_v35, %v954_v24 }
 0x2f2   :  { %v944_v40 = vadd.f32 %v1188_v11, %v930_v36 }
 0x2f3   :  { %v945_v41 = vadd.f32 %v941_v1, %v931_v37  ;;  %v970_v42 = vrot.slane %v956_v38, %v954_v24  ;;  %v971_v3 = vcombine.high %v963_v39, %v963_v39 }
 0x2f5   :  { %v972_v43 = vcombine.high %v970_v42, %v970_v42  ;;  %v1003_v45 = vcombine.low %v944_v40, %v945_v41  ;;  %v976_v46 = vrot.slane %v971_v3, %v1736_v20  ;;  %v980_v47 = vrot.slane %v971_v3, %v1740_v34 }
 0x2f7   :  { %v1010_v49 = vrot.slane %v1003_v45, %v954_v24  ;;  %v984_v51 = vrot.slane %v972_v43, %v1736_v20  ;;  %v988_v52 = vrot.slane %v972_v43, %v1740_v34  ;;  %v993_v56 = vmul.f32 %v1687_v25, %v976_v46 }
 0x2f8   :  { %v994_v57 = vmul.f32 %v1689_v27, %v980_v47  ;;  %v995_v58 = vmul.f32 %v1691_v29, %v976_v46  ;;  %v996_v59 = vmul.f32 %v1693_v31, %v980_v47 }
 0x2f9   :  { %v1011_v53 = vcombine.high %v1010_v49, %v1010_v49  ;;  %v1018_v54 = vrot.slane %v1010_v49, %v954_v24  ;;  %v997_v63 = vmul.f32 %v1707_v44, %v984_v51  ;;  %v998_v0 = vmul.f32 %v1709_v48, %v988_v52 }
 0x2fa   :  { %v999_v2 = vmul.f32 %v1711_v50, %v984_v51  ;;  %v1000_v4 = vmul.f32 %v1713_v55, %v988_v52 }
 0x2fb   :  { %v1025_v60 = vrot.slane %v1011_v53, %v954_v24  ;;  %v1029_v61 = vrot.slane %v1018_v54, %v1736_v20  ;;  %v1033_v62 = vrot.slane %v1018_v54, %v1740_v34 }
 0x2fd   :  { %v1037_v25 = vrot.slane %v1025_v60, %v1736_v20  ;;  %v1041_v27 = vrot.slane %v1025_v60, %v1740_v34  ;;  %v1046_v29 = vadd.f32 %v1029_v61, %v993_v56  ;;  %v1047_v5 = vadd.f32 %v1033_v62, %v994_v57 }
 0x2fe   :  { %v1048_v31 = vadd.f32 %v1029_v61, %v995_v58  ;;  %v1049_v6 = vadd.f32 %v1033_v62, %v996_v59 }
 0x2ff   :  { %v1050_v7 = vadd.f32 %v1037_v25, %v997_v63  ;;  %v1051_v8 = vadd.f32 %v1041_v27, %v998_v0  ;;  %v1052_v9 = vadd.f32 %v1037_v25, %v999_v2  ;;  %v1053_v10 = vadd.f32 %v1041_v27, %v1000_v4 }
 0x300   :  { %v1189_v13 = vmul.f32 -1.442695, %v1046_v29  ;;  %v1190_v44 = vmul.f32 -1.442695, %v1047_v5  ;;  %v1191_v15 = vmul.f32 -1.442695, %v1048_v31 }
 0x301   :  { %v1192_v48 = vmul.f32 -1.442695, %v1049_v6  ;;  %v1193_v50 = vmul.f32 -1.442695, %v1050_v7  ;;  %v1194_v55 = vmul.f32 -1.442695, %v1051_v8 }
 0x302   :  { %1330 = vpow2.f32 %v1189_v13  ;;  %v1195_v20 = vmul.f32 -1.442695, %v1052_v9  ;;  %v1196_v34 = vmul.f32 -1.442695, %v1053_v10 }
 0x303   :  { %1332 = vpow2.f32 %v1190_v44 }
 0x304   :  { %1334 = vpow2.f32 %v1191_v15 }
 0x305   :  { %1336 = vpow2.f32 %v1192_v48 }
 0x306   :  { %1338 = vpow2.f32 %v1193_v50 }
 0x307   :  { %1340 = vpow2.f32 %v1194_v55 }
 0x308   :  { %1342 = vpow2.f32 %v1195_v20 }
 0x309   :  { %1344 = vpow2.f32 %v1196_v34 }
 0x30c   :  { %v1331_v16 = vpop.eup %1330 }
 0x30d   :  { %v1333_v17 = vpop.eup %1332  ;;  %v1078_v18 = vadd.f32 1.0, %v1331_v16 }
 0x30e   :  { %v1335_v19 = vpop.eup %1334  ;;  %v1079_v21 = vadd.f32 1.0, %v1333_v17 }
 0x30f   :  { %v1337_v14 = vpop.eup %1336  ;;  %v1080_v22 = vadd.f32 1.0, %v1335_v19  ;;  %1346 = vrcp.f32 %v1078_v18 }
 0x310   :  { %v1339_v12 = vpop.eup %1338  ;;  %v1081_v24 = vadd.f32 1.0, %v1337_v14  ;;  %1348 = vrcp.f32 %v1079_v21 }
 0x311   :  { %v1341_v23 = vpop.eup %1340  ;;  %v1082_v11 = vadd.f32 1.0, %v1339_v12  ;;  %1350 = vrcp.f32 %v1080_v22 }
 0x312   :  { %v1343_v26 = vpop.eup %1342  ;;  %v1083_v28 = vadd.f32 1.0, %v1341_v23  ;;  %1352 = vrcp.f32 %v1081_v24 }
 0x313   :  { %v1345_v30 = vpop.eup %1344  ;;  %v1084_v32 = vadd.f32 1.0, %v1343_v26  ;;  %1354 = vrcp.f32 %v1082_v11 }
 0x314   :  { %v1085_v33 = vadd.f32 1.0, %v1345_v30  ;;  %1356 = vrcp.f32 %v1083_v28 }
 0x315   :  { %1358 = vrcp.f32 %v1084_v32 }
 0x316   :  { %1360 = vrcp.f32 %v1085_v33 }
 0x319   :  { %v1347_v1 = vpop.eup %1346 }
 0x31a   :  { %v1349_v35 = vpop.eup %1348  ;;  %v1102_v36 = vmul.f32 %v1347_v1, %v1046_v29 }
 0x31b   :  { %v1351_v37 = vpop.eup %1350  ;;  %v1103_v38 = vmul.f32 %v1349_v35, %v1047_v5 }
 0x31c   :  { %v1353_v39 = vpop.eup %1352  ;;  %v1104_v40 = vmul.f32 %v1351_v37, %v1048_v31  ;;  %1110 = vst [vmem:[%s1833_s9] sm:$0xff] %v1102_v36 }
 0x31d   :  { %v1355_v41 = vpop.eup %1354  ;;  %v1105_v42 = vmul.f32 %v1353_v39, %v1049_v6  ;;  %1111 = vst [vmem:[%s1833_s9 + $0x8] sm:$0xff] %v1103_v38 }
 0x31e   :  { %v1357_v3 = vpop.eup %1356  ;;  %v1106_v43 = vmul.f32 %v1355_v41, %v1050_v7  ;;  %1112 = vst [vmem:[%s1833_s9 + $0x10] sm:$0xff] %v1104_v40 }
 0x31f   :  { %v1359_v45 = vpop.eup %1358  ;;  %v1107_v46 = vmul.f32 %v1357_v3, %v1051_v8  ;;  %1113 = vst [vmem:[%s1833_s9 + $0x18] sm:$0xff] %v1105_v42 }
 0x320   :  { %v1361_v47 = vpop.eup %1360  ;;  %v1108_v49 = vmul.f32 %v1359_v45, %v1052_v9  ;;  %1114 = vst [vmem:[%s1833_s9 + $0x20] sm:$0xff] %v1106_v43 }
 0x321   :  { %v1109_v51 = vmul.f32 %v1361_v47, %v1053_v10  ;;  %1115 = vst [vmem:[%s1833_s9 + $0x28] sm:$0xff] %v1107_v46 }
 0x322   :  { %1116 = vst [vmem:[%s1833_s9 + $0x30] sm:$0xff] %v1108_v49 }
 0x323   :  { %1117 = vst [vmem:[%s1833_s9 + $0x38] sm:$0xff] %v1109_v51 }

// kernel: tile.41
= control target key start
LH: loop header
LB: loop body
LE: loop exit
PB: predicated region body
PF: predicated region fallthrough
CT: control target
= control target key end

     0   :  { %s8_s6 = smov 3  ;;  %s11_s7 = smov 12  ;;  %vm13_vm0 = vcmask 1043458   ;;  %vm3_vm1 = vcmask 130048   ;;  %vm17_vm2 = vcmask 1048448   ;;  %vm31_vm3 = vcmask 917248   ;;  %s213_s0 = inlined_call_operand.vmem [shape: f32[2,16,16], index: 0, kind: input, shape index: {}]   ;;  %s214_s1 = inlined_call_operand.vmem [shape: f32[2,256], index: 1, kind: output, shape index: {}]  }
   0x1   :  { %v116_v0 = vld [vmem:[%s213_s0 + $0x7] ss:$16 sm:%s8_s6]   ;;  %v117_v1 = vld [vmem:[%s213_s0 - $0x11] ss:$16 sm:%s11_s7]   ;;  %s36_s12 = smov 3  ;;  %s39_s15 = smov 12 }
   0x2   :  { %v14_v2 = vsel %vm13_vm0, %v117_v1, %v116_v0  ;;  %v120_v3 = vld [vmem:[%s213_s0 + $0x5] ss:$16 sm:%s36_s12]   ;;  %s138_s16 = smov 112   ;;  %v121_v4 = vld [vmem:[%s213_s0 - $0x13] ss:$16 sm:%s39_s15]   ;;  %s22_s19 = smov 3 }
   0x3   :  { %15 = vrot.lane.b32.xlu0 %v14_v2, %s138_s16  ;;  %s25_s20 = smov 12  ;;  %v42_v5 = vsel %vm13_vm0, %v121_v4, %v120_v3  ;;  %v118_v6 = vld [vmem:[%s213_s0 + $0x6] ss:$16 sm:%s22_s19]   ;;  %s50_s25 = smov 3  ;;  %vm45_vm4 = vcmask 786048   ;;  %vm59_vm5 = vcmask 654848  }
   0x4   :  { %v119_v7 = vld [vmem:[%s213_s0 - $0x12] ss:$16 sm:%s25_s20]   ;;  %s139_s26 = smov 80   ;;  %v122_v9 = vld [vmem:[%s213_s0 + $0x4] ss:$16 sm:%s50_s25]   ;;  %s53_s29 = smov 12 }
   0x5   :  { %43 = vrot.lane.b32.xlu1 %v42_v5, %s139_s26  ;;  %v28_v8 = vsel %vm13_vm0, %v119_v7, %v118_v6  ;;  %v123_v10 = vld [vmem:[%s213_s0 - $0x14] ss:$16 sm:%s53_s29]   ;;  %s64_s3 = smov 3  ;;  %s67_s4 = smov 12  ;;  %vm73_vm6 = vcmask 523648   ;;  %vm87_vm7 = vcmask 392448  }
   0x6   :  { %s140_s5 = smov 96   ;;  %v56_v11 = vsel %vm13_vm0, %v123_v10, %v122_v9  ;;  %v124_v12 = vld [vmem:[%s213_s0 + $0x3] ss:$16 sm:%s64_s3]   ;;  %s78_s8 = smov 3  ;;  %v125_v13 = vld [vmem:[%s213_s0 - $0x15] ss:$16 sm:%s67_s4]  }
   0x7   :  { %29 = vrot.lane.b32.xlu0 %v28_v8, %s140_s5  ;;  %v126_v14 = vld [vmem:[%s213_s0 + $0x2] ss:$16 sm:%s78_s8]   ;;  %s81_s13 = smov 12  ;;  %s141_s14 = smov 64   ;;  %v70_v15 = vsel %vm13_vm0, %v125_v13, %v124_v12  ;;  %vm101_vm8 = vcmask 261248  }
   0x8   :  { %v127_v16 = vld [vmem:[%s213_s0 - $0x16] ss:$16 sm:%s81_s13]   ;;  %s92_s17 = smov 3  ;;  %s95_s18 = smov 12 }
   0x9   :  { %57 = vrot.lane.b32.xlu1 %v56_v11, %s141_s14  ;;  %v84_v17 = vsel %vm13_vm0, %v127_v16, %v126_v14  ;;  %v128_v18 = vld [vmem:[%s213_s0 + $0x1] ss:$16 sm:%s92_s17]   ;;  %s142_s23 = smov 48   ;;  %v2_v20 = vld [vmem:[%s213_s0] ss:$8 sm:$0xf]  }
   0xa   :  { %v129_v19 = vld [vmem:[%s213_s0 - $0x17] ss:$16 sm:%s95_s18]   ;;  %4 = vst.msk [vmem:[#allocation0] ss:$8 sm:$0x3] %vm3_vm1, %v2_v20   ;;  %s143_s0 = smov 32  }
   0xb   :  { %71 = vrot.lane.b32.xlu0 %v70_v15, %s142_s23  ;;  %v98_v21 = vsel %vm13_vm0, %v129_v19, %v128_v18  ;;  %6 = vst.msk [vmem:[#allocation0 - $0xf] ss:$8 sm:$0xc] %vm3_vm1, %v2_v20   ;;  %s144_s26 = smov 16  }
   0xd   :  { %85 = vrot.lane.b32.xlu1 %v84_v17, %s143_s0 }
   0xf   :  { %99 = vrot.lane.b32.xlu0 %v98_v21, %s144_s26 }
  0x75   :  { %v16_v22 = vpop.permute.xlu0 %15  }
  0x76   :  { %18 = vst.msk [vmem:[#allocation0] sm:$0x3] %vm17_vm2, %v16_v22   ;;  %20 = vst.msk [vmem:[#allocation0 + $0x6] sm:$0xc] %vm17_vm2, %v16_v22  }
  0x77   :  { %v44_v23 = vpop.permute.xlu1 %43  }
  0x79   :  { %v30_v24 = vpop.permute.xlu0 %29  }
  0x7a   :  { %32 = vst.msk [vmem:[#allocation0] sm:$0x3] %vm31_vm3, %v30_v24   ;;  %34 = vst.msk [vmem:[#allocation0 + $0x6] sm:$0xc] %vm31_vm3, %v30_v24  }
  0x7b   :  { %46 = vst.msk [vmem:[#allocation0] sm:$0x3] %vm45_vm4, %v44_v23   ;;  %48 = vst.msk [vmem:[#allocation0 + $0x6] sm:$0xc] %vm45_vm4, %v44_v23   ;;  %v58_v25 = vpop.permute.xlu1 %57  }
  0x7c   :  { %60 = vst.msk [vmem:[#allocation0] sm:$0x3] %vm59_vm5, %v58_v25   ;;  %62 = vst.msk [vmem:[#allocation0 + $0x6] sm:$0xc] %vm59_vm5, %v58_v25  }
  0x7d   :  { %v72_v26 = vpop.permute.xlu0 %71  }
  0x7e   :  { %74 = vst.msk [vmem:[#allocation0] sm:$0x3] %vm73_vm6, %v72_v26   ;;  %76 = vst.msk [vmem:[#allocation0 + $0x6] sm:$0xc] %vm73_vm6, %v72_v26  }
  0x7f   :  { %v86_v27 = vpop.permute.xlu1 %85  }
  0x80   :  { %88 = vst.msk [vmem:[#allocation0] sm:$0x3] %vm87_vm7, %v86_v27   ;;  %90 = vst.msk [vmem:[#allocation0 + $0x6] sm:$0xc] %vm87_vm7, %v86_v27  }
  0x81   :  { %v100_v28 = vpop.permute.xlu0 %99  }
  0x82   :  { %102 = vst.msk [vmem:[#allocation0] sm:$0x3] %vm101_vm8, %v100_v28   ;;  %104 = vst.msk [vmem:[#allocation0 + $0x6] sm:$0xc] %vm101_vm8, %v100_v28  }
  0x89   :  { %v108_v29 = vld [vmem:[#allocation0] sm:$0x3]  ;;  %v112_v30 = vld [vmem:[#allocation0 + $0x8] sm:$0x3] }
  0x8a   :  { %110 = vst [vmem:[%s214_s1] sm:$0x3] %v108_v29  ;;  %130 = vst [vmem:[%s214_s1 + $0x2] sm:$0x3] %v112_v30 }

// kernel: tile.26
= control target key start
LH: loop header
LB: loop body
LE: loop exit
PB: predicated region body
PF: predicated region fallthrough
CT: control target
= control target key end

     0   :  { %s28_s0 = inlined_call_operand.vmem [shape: f32[16], index: 0, kind: input, shape index: {}]   ;;  %s29_s1 = inlined_call_operand.vmem [shape: f32[16,16], index: 1, kind: output, shape index: {}]  }
   0x1   :  { %v4_v0 = vld [vmem:[%s28_s0] ss:$0 sm:$0xff] }
   0x2   :  { %5 = vst [vmem:[%s29_s1] sm:$0xff] %v4_v0  ;;  %8 = vst [vmem:[%s29_s1 + $0x8] sm:$0xff] %v4_v0 }

// kernel: tile.27
= control target key start
LH: loop header
LB: loop body
LE: loop exit
PB: predicated region body
PF: predicated region fallthrough
CT: control target
= control target key end

     0   :  { %s7_s6 = smov 3  ;;  %s21_s9 = smov 3  ;;  %vm4_vm0 = vcmask 130048   ;;  %vm11_vm1 = vcmask 1048448   ;;  %vm18_vm2 = vcmask 917248   ;;  %vm25_vm3 = vcmask 786048   ;;  %s128_s0 = inlined_call_operand.vmem [shape: f32[16,16], index: 0, kind: input, shape index: {}]   ;;  %s129_s1 = inlined_call_operand.vmem [shape: f32[1,256], index: 1, kind: output, shape index: {}]  }
   0x1   :  { %v66_v0 = vld [vmem:[%s128_s0 + $0x7] ss:$8 sm:%s7_s6]   ;;  %s81_s10 = smov 112   ;;  %v68_v1 = vld [vmem:[%s128_s0 + $0x5] ss:$8 sm:%s21_s9]   ;;  %s14_s13 = smov 3 }
   0x2   :  { %9 = vrot.lane.b32.xlu0 %v66_v0, %s81_s10  ;;  %s82_s14 = smov 80   ;;  %v67_v2 = vld [vmem:[%s128_s0 + $0x6] ss:$8 sm:%s14_s13]   ;;  %s28_s17 = smov 3  ;;  %vm32_vm4 = vcmask 654848   ;;  %vm39_vm5 = vcmask 523648  }
   0x3   :  { %23 = vrot.lane.b32.xlu1 %v68_v1, %s82_s14  ;;  %v69_v3 = vld [vmem:[%s128_s0 + $0x4] ss:$8 sm:%s28_s17]   ;;  %s35_s20 = smov 3  ;;  %s42_s21 = smov 3  ;;  %vm46_vm6 = vcmask 392448   ;;  %vm53_vm7 = vcmask 261248  }
   0x4   :  { %s83_s22 = smov 96   ;;  %s84_s23 = smov 64   ;;  %v70_v4 = vld [vmem:[%s128_s0 + $0x3] ss:$8 sm:%s35_s20]   ;;  %v71_v5 = vld [vmem:[%s128_s0 + $0x2] ss:$8 sm:%s42_s21]  }
   0x5   :  { %s2_s26 = smov 3  ;;  %s49_s29 = smov 3 }
   0x6   :  { %16 = vrot.lane.b32.xlu0 %v67_v2, %s83_s22  ;;  %v3_v6 = vld [vmem:[%s128_s0] ss:$8 sm:%s2_s26]   ;;  %s85_s3 = smov 48   ;;  %s86_s4 = smov 32  }
   0x7   :  { %30 = vrot.lane.b32.xlu1 %v69_v3, %s84_s23  ;;  %5 = vst.msk [vmem:[#allocation0] ss:$8 sm:$0x3] %vm4_vm0, %v3_v6   ;;  %v72_v7 = vld [vmem:[%s128_s0 + $0x1] ss:$8 sm:%s49_s29]   ;;  %s87_s0 = smov 16  }
   0xa   :  { %37 = vrot.lane.b32.xlu0 %v70_v4, %s85_s3 }
   0xb   :  { %44 = vrot.lane.b32.xlu1 %v71_v5, %s86_s4 }
   0xe   :  { %51 = vrot.lane.b32.xlu0 %v72_v7, %s87_s0 }
  0x74   :  { %v10_v8 = vpop.permute.xlu0 %9  }
  0x75   :  { %12 = vst.msk [vmem:[#allocation0] ss:$8 sm:$0x3] %vm11_vm1, %v10_v8   ;;  %v24_v9 = vpop.permute.xlu1 %23  }
  0x78   :  { %v17_v10 = vpop.permute.xlu0 %16  }
  0x79   :  { %19 = vst.msk [vmem:[#allocation0] ss:$8 sm:$0x3] %vm18_vm2, %v17_v10   ;;  %v31_v11 = vpop.permute.xlu1 %30  }
  0x7a   :  { %26 = vst.msk [vmem:[#allocation0] ss:$8 sm:$0x3] %vm25_vm3, %v24_v9  }
  0x7b   :  { %33 = vst.msk [vmem:[#allocation0] ss:$8 sm:$0x3] %vm32_vm4, %v31_v11  }
  0x7c   :  { %v38_v12 = vpop.permute.xlu0 %37  }
  0x7d   :  { %40 = vst.msk [vmem:[#allocation0] ss:$8 sm:$0x3] %vm39_vm5, %v38_v12   ;;  %v45_v13 = vpop.permute.xlu1 %44  }
  0x7e   :  { %47 = vst.msk [vmem:[#allocation0] ss:$8 sm:$0x3] %vm46_vm6, %v45_v13  }
  0x80   :  { %v52_v14 = vpop.permute.xlu0 %51  }
  0x81   :  { %54 = vst.msk [vmem:[#allocation0] ss:$8 sm:$0x3] %vm53_vm7, %v52_v14  }
  0x88   :  { %v58_v15 = vld [vmem:[#allocation0] sm:$0x1]  ;;  %v62_v16 = vld [vmem:[#allocation0 + $0x8] sm:$0x1] }
  0x89   :  { %60 = vst [vmem:[%s129_s1] sm:$0x1] %v58_v15  ;;  %73 = vst [vmem:[%s129_s1 + $0x1] sm:$0x1] %v62_v16 }

// kernel: block_forward.1
= control target key start
LH: loop header
LB: loop body
LE: loop exit
PB: predicated region body
PF: predicated region fallthrough
CT: control target
= control target key end

     0   :  { %v1362_v1 = vmov 0   ;;  %vm170_vm0 = vsmask.f32 3328  ;;  %vm110_vm1 = vcmask 1043456   ;;  %vm171_vm2 = vsmask.f32 7440  ;;  %s1824_s1 = inlined_call_operand.vmem [shape: bf16[3,72,256], index: 1, kind: input, shape index: {}]   ;;  %s1825_s0 = inlined_call_operand.vmem [shape: bf16[2,18,72], index: 0, kind: input, shape index: {}]   ;;  %s1826_s5 = inlined_call_operand.vmem [shape: f32[256,8], index: 5, kind: input, shape index: {}]   ;;  %s1827_s2 = inlined_call_operand.vmem [shape: f32[1,256], index: 2, kind: input, shape index: {}]   ;;  %s1828_s6 = inlined_call_operand.vmem [shape: f32[8,256], index: 6, kind: input, shape index: {}]   ;;  %s1829_s7 = inlined_call_operand.vmem [shape: f32[2,256], index: 7, kind: input, shape index: {}]   ;;  %s1830_s3 = inlined_call_operand.vmem [shape: f32[1,256], index: 3, kind: input, shape index: {}]   ;;  %s1831_s4 = inlined_call_operand.vmem [shape: f32[1,256], index: 4, kind: input, shape index: {}]   ;;  %s1832_s8 = inlined_call_operand.vmem [shape: f32[2,256], index: 8, kind: input, shape index: {}]   ;;  %s1833_s9 = inlined_call_operand.vmem [shape: f32[2,16,256], index: 9, kind: output, shape index: {}]  }
   0x1   :  { %v1284_v0 = vld [vmem:[%s1824_s1 + $0x4c] ss:$8 sps:$4 sm:$0xff]   ;;  %326 = vmatprep.mubr.bf16.mxu0 %v1362_v1  ;;  %149 = vmatprep.mubr.bf16.mxu1 %v1362_v1  ;;  %v1286_v2 = vld [vmem:[%s1824_s1 + $0x48] ss:$8 sps:$4 sm:$0xff]   ;;  %v1287_v3 = vld [vmem:[%s1824_s1 + $0x5c] ss:$8 sps:$4 sm:$0xff]  }
   0x2   :  { %294 = vmatprep.subr.bf16.mxu0 %v1284_v0  ;;  %v1289_v4 = vld [vmem:[%s1824_s1 + $0x58] ss:$8 sps:$4 sm:$0xff]   ;;  %v1290_v5 = vld [vmem:[%s1824_s1 + $0x6c] ss:$8 sps:$4 sm:$0xff]   ;;  %v1292_v6 = vld [vmem:[%s1824_s1 + $0x68] ss:$8 sps:$4 sm:$0xff]  }
   0x3   :  { %295 = vmatpush1.bf16.msra.mxu0 %v1286_v2  ;;  %v1297_v7 = vld [vmem:[%s1824_s1 + $0x4] ss:$8 sps:$4 sm:$0xff]   ;;  %v1300_v8 = vld [vmem:[%s1824_s1] ss:$8 sps:$4 sm:$0xff]   ;;  %v1304_v11 = vld [vmem:[%s1824_s1 + $0x14] ss:$8 sps:$4 sm:$0xff]  }
   0x4   :  { %296 = vmatprep.subr.bf16.mxu0 %v1287_v3  ;;  %v1293_v9 = vld [vmem:[%s1824_s1 + $0x7c] ss:$8 sps:$4 sm:$0xff]   ;;  %v1145_v10 = vld [vmem:[%s1824_s1 + $0x88] sm:$0xff]  ;;  %117 = vmatprep.subr.bf16.mxu1 %v1297_v7  ;;  %v1454_v12 = vld [vmem:[%s1825_s0] sm:$0xf]  ;;  %vm103_vm3 = vcmask 588800  }
   0x5   :  { %118 = vmatpush1.bf16.msra.mxu1 %v1300_v8  ;;  %v1459_v13 = vld [vmem:[%s1825_s0 + $0x4] sm:$0xf]  ;;  %v1464_v14 = vld [vmem:[%s1825_s0 + $0x8] sm:$0x1]  ;;  %v174_v15 = vshrl.u32 %v1454_v12, 16  ;;  %v177_v16 = vshll.u32 %v1454_v12, 16  ;;  %v1157_v20 = vcombine.high %v1145_v10, %v1145_v10  ;;  %v1156_v21 = vcombine.low %v1145_v10, %v1145_v10  ;;  %vm1489_vm4 = vmor %vm170_vm0, %vm171_vm2 }
   0x6   :  { %v183_v17 = vshll.u32 %v1459_v13, 16  ;;  %v187_v18 = vshrl.u32 %v1459_v13, 16  ;;  %v1295_v19 = vld [vmem:[%s1824_s1 + $0x78] ss:$8 sps:$4 sm:$0xff]   ;;  %119 = vmatprep.subr.bf16.mxu1 %v1304_v11  ;;  %v193_v22 = vshll.u32 %v1464_v14, 16  ;;  %v362_v7 = vrot.slane %v1459_v13, 5 }
   0x7   :  { %297 = vmatpush1.bf16.msra.mxu0 %v1289_v4  ;;  %v1306_v23 = vld [vmem:[%s1824_s1 + $0x10] ss:$8 sps:$4 sm:$0xff]   ;;  %v176_v24 = vrot.slane %v174_v15, 4  ;;  %v179_v25 = vrot.slane %v177_v16, 5  ;;  %v1310_v31 = vld [vmem:[%s1824_s1 + $0x24] ss:$8 sps:$4 sm:$0xff]   ;;  %v1122_v4 = vcombine.low %v1454_v12, %v1459_v13 }
   0x8   :  { %298 = vmatprep.subr.bf16.mxu0 %v1290_v5  ;;  %v185_v26 = vrot.slane %v183_v17, 5  ;;  %v189_v27 = vrot.slane %v187_v18, 4  ;;  %v195_v30 = vrot.slane %v193_v22, 5  ;;  %v1312_v32 = vld [vmem:[%s1824_s1 + $0x20] ss:$8 sps:$4 sm:$0xff]   ;;  %v289_v33 = vsel %vm110_vm1, %v1156_v21, 0 }
   0x9   :  { %120 = vmatpush1.bf16.msra.mxu1 %v1306_v23  ;;  %v180_v28 = vor.u32 %v179_v25, %v176_v24  ;;  %v1303_v34 = vld [vmem:[%s1824_s1 + $0x94] ss:$8 sps:$4 sm:$0xff]   ;;  %v1318_v39 = vld [vmem:[%s1824_s1 + $0x30] ss:$8 sps:$4 sm:$0xff]   ;;  %v1503_v40 = vld [vmem:[%s1825_s0 + $0xc] sm:$0xf] }
   0xa   :  { %v190_v29 = vor.u32 %v189_v27, %v185_v26  ;;  %121 = vmatprep.subr.bf16.mxu1 %v1310_v31  ;;  %v1316_v38 = vld [vmem:[%s1824_s1 + $0x34] ss:$8 sps:$4 sm:$0xff]   ;;  %v1508_v41 = vld [vmem:[%s1825_s0 + $0x10] sm:$0xf]  ;;  %v198_v45 = vshrl.u32 %v1503_v40, 16  ;;  %v201_v46 = vshll.u32 %v1503_v40, 16 }
   0xb   :  { %299 = vmatpush1.bf16.msra.mxu0 %v1292_v6  ;;  %v181_v36 = vrot.slane %v180_v28, 4  ;;  %v1517_v44 = vld [vmem:[%s1825_s0 + $0x14] sm:$0x1]  ;;  %v1301_v47 = vld [vmem:[%s1824_s1 + $0x90] ss:$8 sps:$4 sm:$0xff]   ;;  %v207_v49 = vshll.u32 %v1508_v41, 16 }
   0xc   :  { %300 = vmatprep.subr.bf16.mxu0 %v1293_v9  ;;  %v191_v37 = vrot.slane %v190_v29, 4  ;;  %v211_v50 = vshrl.u32 %v1508_v41, 16  ;;  %v217_v51 = vshll.u32 %v1517_v44, 16  ;;  %v47_v52 = vld [vmem:[%s1824_s1 + $0x40] sm:$0xff]  ;;  %v200_v54 = vrot.slane %v198_v45, 4  ;;  %v1171_v13 = vld [vmem:[%s1824_s1 + $0xd0] sm:$0xff] }
   0xd   :  { %122 = vmatpush1.bf16.msra.mxu1 %v1312_v32  ;;  %v186_v42 = vsel %vm1489_vm4, %v181_v36, %v185_v26  ;;  %v1309_v53 = vld [vmem:[%s1824_s1 + $0xa4] ss:$8 sps:$4 sm:$0xff]   ;;  %v203_v55 = vrot.slane %v201_v46, 5  ;;  %v1133_v56 = vcombine.high %v47_v52, %v47_v52  ;;  %v1132_v57 = vcombine.low %v47_v52, %v47_v52  ;;  %v1307_v62 = vld [vmem:[%s1824_s1 + $0xa0] ss:$8 sps:$4 sm:$0xff]   ;;  %v672_v52 = vld [vmem:[%s1826_s5 + $0x30] sm:$0xff] }
   0xe   :  { %v196_v43 = vsel %vm1489_vm4, %v191_v37, %v195_v30  ;;  %123 = vmatprep.subr.bf16.mxu1 %v1316_v38  ;;  %v209_v58 = vrot.slane %v207_v49, 5  ;;  %v213_v59 = vrot.slane %v211_v50, 4  ;;  %v219_v0 = vrot.slane %v217_v51, 5  ;;  %v1315_v2 = vld [vmem:[%s1824_s1 + $0xb4] ss:$8 sps:$4 sm:$0xff]   ;;  %v682_v32 = vld [vmem:[%s1826_s5 + $0x80] sm:$0xff] }
   0xf   :  { %301 = vmatpush1.bf16.msra.mxu0 %v1295_v19  ;;  %v1146_v48 = vcombine.low %v186_v42, %v196_v43  ;;  %v204_v60 = vor.u32 %v203_v55, %v200_v54  ;;  %v112_v61 = vsel %vm110_vm1, %v1132_v57, 0  ;;  %v1313_v8 = vld [vmem:[%s1824_s1 + $0xb0] ss:$8 sps:$4 sm:$0xff]   ;;  %v1321_v11 = vld [vmem:[%s1824_s1 + $0xc4] ss:$8 sps:$4 sm:$0xff]   ;;  %vm357_vm5 = vcmask 1042432  }
  0x10   :  { %1158 = vmatprep.subr.msk.bf16.mxu0 %vm110_vm1, %v1157_v20  ;;  %v214_v63 = vor.u32 %v213_v59, %v209_v58  ;;  %vm358_vm6 = vcmask 1046532   ;;  %v365_v15 = vrot.slane %v1464_v14, 5  ;;  %v1319_v16 = vld [vmem:[%s1824_s1 + $0xc0] ss:$8 sps:$4 sm:$0xff]   ;;  %v1161_v17 = vrot.slane %v1454_v12, 9  ;;  %v684_v37 = vld [vmem:[%s1826_s5 + $0x90] sm:$0xff] }
  0x11   :  { %124 = vmatpush1.bf16.msra.mxu1 %v1318_v39  ;;  %v205_v3 = vrot.slane %v204_v60, 4  ;;  %v364_v18 = vrot.slane %v362_v7, 4  ;;  %v1183_v19 = vcombine.high %v1171_v13, %v1171_v13  ;;  %v1182_v20 = vcombine.low %v1171_v13, %v1171_v13  ;;  %vm1568_vm7 = vmor %vm357_vm5, %vm358_vm6  ;;  %v667_v35 = vld [vmem:[%s1826_s5 + $0x8] sm:$0xff]  ;;  %v685_v38 = vld [vmem:[%s1826_s5 + $0x98] sm:$0xff] }
  0x12   :  { %1134 = vmatprep.subr.msk.bf16.mxu1 %vm110_vm1, %v1133_v56  ;;  %v215_v5 = vrot.slane %v214_v63, 4  ;;  %v1123_v14 = vcombine.low %v1503_v40, %v1508_v41  ;;  %v363_v22 = vsel %vm1568_vm7, %v1161_v17, %v362_v7  ;;  %v369_v12 = vrot.slane %v1508_v41, 5  ;;  %v669_v41 = vld [vmem:[%s1826_s5 + $0x18] sm:$0xff]  ;;  %v686_v43 = vld [vmem:[%s1826_s5 + $0xa0] sm:$0xff]  ;;  %v688_v49 = vld [vmem:[%s1826_s5 + $0xb0] sm:$0xff] }
  0x13   :  { %303 = vmatpush1.bf16.msra.mxu0 %v289_v33  ;;  %v210_v6 = vsel %vm1489_vm4, %v205_v3, %v209_v58  ;;  %v366_v23 = vsel %vm1568_vm7, %v364_v18, %v365_v15  ;;  %v442_v24 = vsel %vm110_vm1, %v1182_v20, 0  ;;  %v1162_v26 = vrot.slane %v1503_v40, 9  ;;  %v683_v33 = vld [vmem:[%s1826_s5 + $0x88] sm:$0xff]  ;;  %v668_v40 = vld [vmem:[%s1826_s5 + $0x10] sm:$0xff]  ;;  %v670_v46 = vld [vmem:[%s1826_s5 + $0x20] sm:$0xff] }
  0x14   :  { %447 = vmatprep.subr.bf16.mxu0 %v1303_v34  ;;  %v220_v9 = vsel %vm1489_vm4, %v215_v5, %v219_v0  ;;  %v1172_v25 = vcombine.low %v363_v22, %v366_v23  ;;  %v371_v27 = vrot.slane %v369_v12, 4  ;;  %v372_v28 = vrot.slane %v1517_v44, 5  ;;  %v687_v44 = vld [vmem:[%s1826_s5 + $0xa8] sm:$0xff]  ;;  %v689_v50 = vld [vmem:[%s1826_s5 + $0xb8] sm:$0xff]  ;;  %v690_v55 = vld [vmem:[%s1826_s5 + $0xc0] sm:$0xff] }
  0x15   :  { %126 = vmatpush1.bf16.msra.mxu1 %v112_v61  ;;  %v1147_v10 = vcombine.low %v210_v6, %v220_v9  ;;  %v370_v29 = vsel %vm1568_vm7, %v1162_v26, %v369_v12  ;;  %v1232_v34 = vpack.c.bf16 %v683_v33, %v682_v32  ;;  %v1236_v39 = vpack.c.bf16 %v685_v38, %v684_v37  ;;  %v691_v56 = vld [vmem:[%s1826_s5 + $0xc8] sm:$0xff]  ;;  %v674_v58 = vld [vmem:[%s1826_s5 + $0x40] sm:$0xff]  ;;  %v692_v61 = vld [vmem:[%s1826_s5 + $0xd0] sm:$0xff] }
  0x16   :  { %1159 = vmatmul.mubr.msk.bf16.vlgmr.msra.gmra.mrb[0].mxu0 %vm103_vm3, %v1146_v48  ;;  %v373_v30 = vsel %vm1568_vm7, %v371_v27, %v372_v28  ;;  %v1238_v42 = vpack.c.bf16 %v669_v41, %v668_v40  ;;  %v1240_v45 = vpack.c.bf16 %v687_v44, %v686_v43  ;;  %v1244_v51 = vpack.c.bf16 %v689_v50, %v688_v49  ;;  %v675_v59 = vld [vmem:[%s1826_s5 + $0x48] sm:$0xff]  ;;  %v676_v63 = vld [vmem:[%s1826_s5 + $0x50] sm:$0xff]  ;;  %v694_v3 = vld [vmem:[%s1826_s5 + $0xe0] sm:$0xff] }
  0x17   :  { %448 = vmatpush1.bf16.msra.mxu0 %v1301_v47  ;;  %336 = vmatprep.mubr.bf16.mxu0 %v1362_v1  ;;  %v1173_v31 = vcombine.low %v370_v29, %v373_v30  ;;  %v671_v47 = vld [vmem:[%s1826_s5 + $0x28] sm:$0xff]  ;;  %v1248_v57 = vpack.c.bf16 %v691_v56, %v690_v55  ;;  %v1250_v60 = vpack.c.bf16 %v675_v59, %v674_v58  ;;  %v678_v7 = vld [vmem:[%s1826_s5 + $0x60] sm:$0xff]  ;;  %v696_v9 = vld [vmem:[%s1826_s5 + $0xf0] sm:$0xff]  ;;  %vm589_vm8 = vcmask 1041409  }
  0x18   :  { %449 = vmatprep.subr.bf16.mxu0 %v1309_v53  ;;  %1135 = vmatmul.mubr.msk.bf16.vlgmr.msra.gmra.mrb[0].mxu1 %vm103_vm3, %v1122_v4  ;;  %v1242_v48 = vpack.c.bf16 %v671_v47, %v670_v46  ;;  %v673_v53 = vld [vmem:[%s1826_s5 + $0x38] sm:$0xff]  ;;  %v695_v4 = vld [vmem:[%s1826_s5 + $0xe8] sm:$0xff]  ;;  %v680_v15 = vld [vmem:[%s1826_s5 + $0x70] sm:$0xff]  ;;  %vm656_vm9 = vcmask 1043459   ;;  %vm663_vm10 = vcmask 1041408   ;;  %vm780_vm11 = vcmask 64512  }
  0x19   :  { %159 = vmatprep.mubr.bf16.mxu1 %v1362_v1  ;;  %1233 = vmatprep.subr.bf16.mxu1 %v1232_v34  ;;  %v1246_v54 = vpack.c.bf16 %v673_v53, %v672_v52  ;;  %v1256_v6 = vpack.c.bf16 %v695_v4, %v694_v3  ;;  %v575_v52 = vlaneseq }
  0x1b   :  { %450 = vmatpush1.bf16.msra.mxu0 %v1307_v62  ;;  %v693_v62 = vld [vmem:[%s1826_s5 + $0xd8] sm:$0xff]  ;;  %v1727_v3 = vshrl.u32 %v575_v52, 7 }
  0x1c   :  { %451 = vmatprep.subr.bf16.mxu0 %v1315_v2  ;;  %v1252_v0 = vpack.c.bf16 %v693_v62, %v692_v61  ;;  %v677_v2 = vld [vmem:[%s1826_s5 + $0x58] sm:$0xff] }
  0x1d   :  { %v1254_v5 = vpack.c.bf16 %v677_v2, %v676_v63 }
  0x1e   :  { %1160 = vmatmul.mubr.msk.bf16.gmra.mrb[4].mxu0 %vm103_vm3, %v1147_v10  ;;  %v697_v10 = vld [vmem:[%s1826_s5 + $0xf8] sm:$0xff] }
  0x1f   :  { %452 = vmatpush1.bf16.msra.mxu0 %v1313_v8  ;;  %479 = vmatprep.mubr.bf16.mxu0 %v1362_v1  ;;  %v679_v8 = vld [vmem:[%s1826_s5 + $0x68] sm:$0xff]  ;;  %v1260_v13 = vpack.c.bf16 %v697_v10, %v696_v9 }
  0x20   :  { %453 = vmatprep.subr.bf16.mxu0 %v1321_v11  ;;  %1136 = vmatmul.mubr.msk.bf16.gmra.mrb[4].mxu1 %vm103_vm3, %v1123_v14  ;;  %v1258_v11 = vpack.c.bf16 %v679_v8, %v678_v7 }
  0x23   :  { %454 = vmatpush1.bf16.msra.mxu0 %v1319_v16  ;;  %v681_v16 = vld [vmem:[%s1826_s5 + $0x78] sm:$0xff] }
  0x24   :  { %1184 = vmatprep.subr.msk.bf16.mxu0 %vm110_vm1, %v1183_v19  ;;  %v1262_v17 = vpack.c.bf16 %v681_v16, %v680_v15 }
  0x27   :  { %456 = vmatpush1.bf16.msra.mxu0 %v442_v24 }
  0x2a   :  { %1185 = vmatmul.mubr.msk.bf16.vlgmr.msra.gmra.mrb[0].mxu0 %vm103_vm3, %v1172_v25 }
  0x2b   :  { %489 = vmatprep.mubr.bf16.mxu0 %v1362_v1  ;;  %v666_v1 = vld [vmem:[%s1826_s5] sm:$0xff] }
  0x2c   :  { %v1234_v36 = vpack.c.bf16 %v667_v35, %v666_v1 }
  0x2e   :  { %1235 = vmatpush3.bf16.msra.mxu1 %v1234_v36 }
  0x2f   :  { %1237 = vmatprep.subr.bf16.mxu1 %v1236_v39 }
  0x32   :  { %1186 = vmatmul.mubr.msk.bf16.gmra.mrb[4].mxu0 %vm103_vm3, %v1173_v31  ;;  %1239 = vmatpush3.bf16.msra.mxu1 %v1238_v42 }
  0x33   :  { %1241 = vmatprep.subr.bf16.mxu1 %v1240_v45 }
  0x36   :  { %1243 = vmatpush3.bf16.msra.mxu1 %v1242_v48 }
  0x37   :  { %1245 = vmatprep.subr.bf16.mxu1 %v1244_v51 }
  0x3a   :  { %1247 = vmatpush3.bf16.msra.mxu1 %v1246_v54 }
  0x3b   :  { %1249 = vmatprep.subr.bf16.mxu1 %v1248_v57 }
  0x3e   :  { %1251 = vmatpush3.bf16.msra.mxu1 %v1250_v60 }
  0x3f   :  { %1253 = vmatprep.subr.bf16.mxu1 %v1252_v0 }
  0x42   :  { %1255 = vmatpush3.bf16.msra.mxu1 %v1254_v5 }
  0x43   :  { %1257 = vmatprep.subr.bf16.mxu1 %v1256_v6 }
  0x46   :  { %1259 = vmatpush3.bf16.msra.mxu1 %v1258_v11  ;;  %v1732_v11 = vld [vmem:[%s1827_s2] sm:$0x3] }
  0x47   :  { %1261 = vmatprep.subr.bf16.mxu1 %v1260_v13 }
  0x4a   :  { %1263 = vmatpush3.bf16.msra.mxu1 %v1262_v17 }
  0xeb   :  { %v151_v18 = vpop.f32.mrb[0].mxu1 }
  0xec   :  { %v153_v19 = vpop.f32.mrb[1].mxu1 }
  0xed   :  { %v155_v20 = vpop.f32.mrb[2].mxu1 }
  0xee   :  { %v157_v21 = vpop.f32.mrb[3].mxu1 }
  0xf3   :  { %v161_v14 = vpop.f32.mrb[4].mxu1 }
  0xf4   :  { %v163_v22 = vpop.f32.mrb[5].mxu1 }
  0xf5   :  { %v165_v23 = vpop.f32.mrb[6].mxu1 }
  0xf6   :  { %v167_v12 = vpop.f32.mrb[7].mxu1 }
  0xfd   :  { %v481_v24 = vpop.f32.mrb[0].mxu0 }
  0xfe   :  { %v1687_v25 = vadd.f32 %v481_v24, %v151_v18  ;;  %v483_v26 = vpop.f32.mrb[1].mxu0 }
  0xff   :  { %v1689_v27 = vadd.f32 %v483_v26, %v153_v19  ;;  %v485_v28 = vpop.f32.mrb[2].mxu0  ;;  %v573_v19 = vmul.f32 2.0, %v1732_v11 }
 0x100   :  { %v1691_v29 = vadd.f32 %v485_v28, %v155_v20  ;;  %v487_v30 = vpop.f32.mrb[3].mxu0  ;;  %v537_v32 = vmul.f32 %v1687_v25, %v1687_v25  ;;  %v1736_v20 = vsub.s32 0, %v1727_v3 }
 0x101   :  { %v1693_v31 = vadd.f32 %v487_v30, %v157_v21  ;;  %v538_v1 = vmul.f32 %v1689_v27, %v1689_v27 }
 0x102   :  { %v509_v33 = vadd.f32 %v1691_v29, %v1687_v25  ;;  %v539_v34 = vmul.f32 %v1691_v29, %v1691_v29 }
 0x103   :  { %v516_v35 = vadd.f32 %v1693_v31, %v1689_v27  ;;  %v540_v36 = vmul.f32 %v1693_v31, %v1693_v31 }
 0x104   :  { %v510_v37 = vrot.slane %v509_v33, 4  ;;  %v545_v38 = vadd.f32 %v539_v34, %v537_v32  ;;  %v1740_v34 = vsub.s32 1, %v1727_v3 }
 0x105   :  { %v517_v39 = vrot.slane %v516_v35, 4  ;;  %v552_v40 = vadd.f32 %v540_v36, %v538_v1  ;;  %v491_v41 = vpop.f32.mrb[4].mxu0  ;;  %v578_v36 = vrot.slane %v573_v19, %v1736_v20 }
 0x106   :  { %v511_v42 = vadd.f32 %v510_v37, %v509_v33  ;;  %v546_v43 = vrot.slane %v545_v38, 4  ;;  %v1707_v44 = vadd.f32 %v491_v41, %v161_v14  ;;  %v493_v45 = vpop.f32.mrb[5].mxu0 }
 0x107   :  { %v518_v46 = vadd.f32 %v517_v39, %v516_v35  ;;  %v553_v47 = vrot.slane %v552_v40, 4  ;;  %v1709_v48 = vadd.f32 %v493_v45, %v163_v22  ;;  %v495_v49 = vpop.f32.mrb[6].mxu0  ;;  %v582_v45 = vrot.slane %v573_v19, %v1740_v34 }
 0x108   :  { %v1711_v50 = vadd.f32 %v495_v49, %v165_v23  ;;  %v497_v51 = vpop.f32.mrb[7].mxu0  ;;  %v512_v53 = vrot.slane %v511_v42, 2  ;;  %v547_v54 = vadd.f32 %v546_v43, %v545_v38  ;;  %v541_v57 = vmul.f32 %v1707_v44, %v1707_v44 }
 0x109   :  { %v1713_v55 = vadd.f32 %v497_v51, %v167_v12  ;;  %v554_v56 = vadd.f32 %v553_v47, %v552_v40  ;;  %v519_v60 = vrot.slane %v518_v46, 2  ;;  %v542_v61 = vmul.f32 %v1709_v48, %v1709_v48 }
 0x10a   :  { %v523_v58 = vadd.f32 %v1711_v50, %v1707_v44  ;;  %v543_v59 = vmul.f32 %v1711_v50, %v1711_v50  ;;  %v548_v4 = vrot.slane %v547_v54, 2  ;;  %v513_v7 = vadd.f32 %v512_v53, %v511_v42 }
 0x10b   :  { %v530_v62 = vadd.f32 %v1713_v55, %v1709_v48  ;;  %v544_v63 = vmul.f32 %v1713_v55, %v1713_v55  ;;  %v555_v8 = vrot.slane %v554_v56, 2  ;;  %v520_v13 = vadd.f32 %v519_v60, %v518_v46 }
 0x10c   :  { %v524_v0 = vrot.slane %v523_v58, 4  ;;  %v559_v2 = vadd.f32 %v543_v59, %v541_v57  ;;  %v549_v21 = vadd.f32 %v548_v4, %v547_v54  ;;  %v608_v23 = vmul.f32 16.0, %v1732_v11 }
 0x10d   :  { %v531_v5 = vrot.slane %v530_v62, 4  ;;  %v566_v6 = vadd.f32 %v544_v63, %v542_v61  ;;  %v514_v12 = vrot.slane %v513_v7, 1  ;;  %v556_v24 = vadd.f32 %v555_v8, %v554_v56 }
 0x10e   :  { %v525_v9 = vadd.f32 %v524_v0, %v523_v58  ;;  %v560_v10 = vrot.slane %v559_v2, 4  ;;  %v521_v30 = vrot.slane %v520_v13, 1  ;;  %v550_v37 = vrot.slane %v549_v21, 1 }
 0x10f   :  { %v532_v15 = vadd.f32 %v531_v5, %v530_v62  ;;  %v567_v16 = vrot.slane %v566_v6, 4  ;;  %v609_v40 = vmul.f32 %v608_v23, %v1732_v11  ;;  %v515_v41 = vadd.f32 %v514_v12, %v513_v7 }
 0x110   :  { %v526_v17 = vrot.slane %v525_v9, 2  ;;  %v561_v18 = vadd.f32 %v560_v10, %v559_v2  ;;  %v557_v42 = vrot.slane %v556_v24, 1  ;;  %v522_v47 = vadd.f32 %v521_v30, %v520_v13 }
 0x111   :  { %v533_v14 = vrot.slane %v532_v15, 2  ;;  %v568_v22 = vadd.f32 %v567_v16, %v566_v6  ;;  %v551_v53 = vadd.f32 %v550_v37, %v549_v21  ;;  %v614_v57 = vrot.slane %v609_v40, %v1736_v20 }
 0x112   :  { %v527_v26 = vadd.f32 %v526_v17, %v525_v9  ;;  %v562_v28 = vrot.slane %v561_v18, 2  ;;  %v558_v58 = vadd.f32 %v557_v42, %v556_v24  ;;  %v618_v60 = vrot.slane %v609_v40, %v1740_v34 }
 0x113   :  { %v534_v32 = vadd.f32 %v533_v14, %v532_v15  ;;  %v569_v33 = vrot.slane %v568_v22, 2  ;;  %v633_v61 = vrot.slane %v608_v23, %v1740_v34  ;;  %v629_v2 = vrot.slane %v608_v23, %v1736_v20 }
 0x114   :  { %v528_v1 = vrot.slane %v527_v26, 1  ;;  %v563_v35 = vadd.f32 %v562_v28, %v561_v18  ;;  %v1363_v37 = vmov 0.0  }
 0x115   :  { %v535_v38 = vrot.slane %v534_v32, 1  ;;  %v570_v39 = vadd.f32 %v569_v33, %v568_v22  ;;  %v637_v22 = vadd.f32 %v633_v61, %v522_v47  ;;  %v636_v23 = vadd.f32 %v629_v2, %v515_v41 }
 0x116   :  { %v529_v43 = vadd.f32 %v528_v1, %v527_v26  ;;  %v564_v46 = vrot.slane %v563_v35, 1 }
 0x117   :  { %v536_v49 = vadd.f32 %v535_v38, %v534_v32  ;;  %v571_v51 = vrot.slane %v570_v39, 1 }
 0x118   :  { %v590_v52 = vsel %vm589_vm8, %v529_v43, %v515_v41  ;;  %v565_v62 = vadd.f32 %v564_v46, %v563_v35  ;;  %v638_v10 = vadd.f32 %v629_v2, %v529_v43  ;;  %v779_v35 = vld [vmem:[%s1828_s6 + $0x8] sm:$0xff]  ;;  %v869_v2 = vld [vmem:[%s1831_s4] sm:$0x3] }
 0x119   :  { %v591_v54 = vsel %vm589_vm8, %v536_v49, %v522_v47  ;;  %v594_v56 = vmul.f32 %v590_v52, %v578_v36  ;;  %v572_v4 = vadd.f32 %v571_v51, %v570_v39  ;;  %v639_v7 = vadd.f32 %v633_v61, %v536_v49  ;;  %784 = vmatprep.subr.mxu1 %v779_v35  ;;  %v778_v36 = vld [vmem:[%s1828_s6] sm:$0xff] }
 0x11a   :  { %v595_v59 = vmul.f32 %v591_v54, %v582_v45  ;;  %v644_v19 = vrot.slane %v638_v10, 7  ;;  %v1364_v51 = vmov 1983009808   ;;  %v1365_v61 = vmov 1966171168  }
 0x11b   :  { %v598_v63 = vrot.slane %v594_v56, 1  ;;  %v604_v0 = vadd.f32 %v594_v56, %v551_v53  ;;  %v646_v18 = vrot.slane %v639_v7, 7  ;;  %v909_v52 = vunpack.c.l.s4 %v1364_v51  ;;  %v904_v53 = vld [vmem:[%s1829_s7] sm:$0xf] }
 0x11c   :  { %v599_v5 = vrot.slane %v595_v59, 1  ;;  %v605_v6 = vadd.f32 %v595_v59, %v558_v58  ;;  %v645_v33 = vsel %vm589_vm8, %v644_v19, %v636_v23  ;;  %v905_v54 = vadd.f32 1.0, %v904_v53  ;;  %v855_v59 = vld [vmem:[%s1830_s3] sm:$0x3] }
 0x11d   :  { %v606_v8 = vadd.f32 %v598_v63, %v565_v62  ;;  %v621_v9 = vadd.f32 %v614_v57, %v604_v0  ;;  %v647_v28 = vsel %vm589_vm8, %v646_v18, %v637_v22  ;;  %v910_v56 = vunpack.c.0.s8 %v909_v52 }
 0x11e   :  { %v607_v13 = vadd.f32 %v599_v5, %v572_v4  ;;  %v622_v15 = vadd.f32 %v618_v60, %v605_v6  ;;  %v950_v62 = vunpack.c.l.s4 %v1365_v61  ;;  %v860_v63 = vrot.slane %v855_v59, %v1736_v20 }
 0x11f   :  { %v623_v16 = vadd.f32 %v614_v57, %v606_v8  ;;  %v654_v21 = vrot.slane %v621_v9, 6  ;;  %v907_v57 = vcombine.low %v905_v54, %v905_v54  ;;  %v913_v58 = vsub.s32 %v910_v56, %v1727_v3 }
 0x120   :  { %v624_v17 = vadd.f32 %v618_v60, %v607_v13  ;;  %v658_v12 = vrot.slane %v622_v15, 6  ;;  %v864_v0 = vrot.slane %v855_v59, %v1740_v34  ;;  %v874_v4 = vrot.slane %v1732_v11, %v1736_v20 }
 0x121   :  { %v655_v14 = vrot.slane %v623_v16, 5  ;;  %v914_v60 = vrot.slane %v907_v57, %v913_v58  ;;  %v878_v6 = vrot.slane %v1732_v11, %v1740_v34  ;;  %v951_v8 = vunpack.c.0.s8 %v950_v62  ;;  %v1188_v11 = vld.sshfl [vmem:[%s1832_s8] sm:$0x33 pattern:$0x76325410] }
 0x122   :  { %v659_v24 = vrot.slane %v624_v17, 5  ;;  %v895_v13 = vrot.slane %v869_v2, %v1736_v20  ;;  %v921_v15 = vrot.slane %v905_v54, %v913_v58 }
 0x123   :  { %v657_v26 = vsel %vm656_vm9, %v655_v14, %v654_v21  ;;  %v922_v7 = vcombine.high %v914_v60, %v914_v60  ;;  %v899_v21 = vrot.slane %v869_v2, %v1740_v34 }
 0x124   :  { %v660_v30 = vsel %vm656_vm9, %v659_v24, %v658_v12  ;;  %v664_v1 = vsel %vm663_vm10, %v645_v33, %v657_v26  ;;  %v954_v24 = vsub.s32 %v951_v8, %v1727_v3 }
 0x125   :  { %v665_v32 = vsel %vm663_vm10, %v647_v28, %v660_v30  ;;  %v927_v28 = vcombine.high %v921_v15, %v921_v15 }
 0x126   :  { %762 = vmatprep.mubr.f32.mxu1 %v665_v32 }
 0x127   :  { %763 = vmatmul.mubr.f32.vlgmr.msra.gmra.mrb[8].mxu1 %v664_v1  ;;  %v941_v1 = vcombine.high %v1188_v11, %v1188_v11 }
 0x128   :  { %785 = vmatpush1.msra.mxu1 %v778_v36  ;;  %848 = vmatprep.mubr.f32.mxu1 %v1363_v37 }
 0x1fa   :  { %v1229_v38 = vpop.f32.mrb[8].mxu1 }
 0x1fb   :  { %v1230_v39 = vpop.f32.mrb[9].mxu1 }
 0x1fc   :  { %v1231_v40 = vadd.f32 %v1230_v39, %v1229_v38 }
 0x1fe   :  { %v769_v41 = vmul.f32 0.001953125, %v1231_v40 }
 0x200   :  { %v770_v42 = vmul.f32 %v769_v41, %v769_v41 }
 0x202   :  { %v772_v43 = vrot.slane %v770_v42, 6 }
 0x204   :  { %v774_v45 = vsub.f32 %v769_v41, %v772_v43 }
 0x206   :  { %v775_v46 = vadd.f32 1e-05, %v774_v45 }
 0x208   :  { %1328 = vrsqrt.f32 %v775_v46 }
 0x212   :  { %v1329_v47 = vpop.eup %1328 }
 0x213   :  { %v777_v49 = vsel %vm663_vm10, %v769_v41, %v1329_v47 }
 0x214   :  { %1187 = vmatmul.mubr.msk.f32.vlgmr.msra.gmra.mrb[10].mxu1 %vm780_vm11, %v777_v49 }
 0x2e7   :  { %v850_v5 = vpop.f32.mrb[10].mxu1 }
 0x2e8   :  { %v867_v9 = vmul.f32 %v860_v63, %v850_v5  ;;  %v852_v10 = vpop.f32.mrb[11].mxu1  ;;  %v881_v17 = vsub.f32 %v874_v4, %v850_v5 }
 0x2e9   :  { %v868_v16 = vmul.f32 %v864_v0, %v852_v10  ;;  %v882_v14 = vsub.f32 %v878_v6, %v852_v10 }
 0x2ea   :  { %v885_v18 = vrot.slane %v867_v9, 2  ;;  %v925_v19 = vmul.f32 %v914_v60, %v867_v9 }
 0x2eb   :  { %v886_v22 = vrot.slane %v868_v16, 2  ;;  %v926_v12 = vmul.f32 %v922_v7, %v868_v16 }
 0x2ec   :  { %v889_v23 = vmul.f32 %v885_v18, %v881_v17 }
 0x2ed   :  { %v890_v26 = vmul.f32 %v886_v22, %v882_v14  ;;  %v948_v30 = vcombine.low %v925_v19, %v926_v12 }
 0x2ee   :  { %v902_v32 = vadd.f32 %v895_v13, %v889_v23 }
 0x2ef   :  { %v903_v33 = vadd.f32 %v899_v21, %v890_v26  ;;  %v955_v35 = vrot.slane %v948_v30, %v954_v24 }
 0x2f0   :  { %v930_v36 = vmul.f32 %v921_v15, %v902_v32 }
 0x2f1   :  { %v931_v37 = vmul.f32 %v927_v28, %v903_v33  ;;  %v956_v38 = vcombine.high %v955_v35, %v955_v35  ;;  %v963_v39 = vrot.slane %v955_v35, %v954_v24 }
 0x2f2   :  { %v944_v40 = vadd.f32 %v1188_v11, %v930_v36 }
 0x2f3   :  { %v945_v41 = vadd.f32 %v941_v1, %v931_v37  ;;  %v970_v42 = vrot.slane %v956_v38, %v954_v24  ;;  %v971_v3 = vcombine.high %v963_v39, %v963_v39 }
 0x2f5   :  { %v972_v43 = vcombine.high %v970_v42, %v970_v42  ;;  %v1003_v45 = vcombine.low %v944_v40, %v945_v41  ;;  %v976_v46 = vrot.slane %v971_v3, %v1736_v20  ;;  %v980_v47 = vrot.slane %v971_v3, %v1740_v34 }
 0x2f7   :  { %v1010_v49 = vrot.slane %v1003_v45, %v954_v24  ;;  %v984_v51 = vrot.slane %v972_v43, %v1736_v20  ;;  %v988_v52 = vrot.slane %v972_v43, %v1740_v34  ;;  %v993_v56 = vmul.f32 %v1687_v25, %v976_v46 }
 0x2f8   :  { %v994_v57 = vmul.f32 %v1689_v27, %v980_v47  ;;  %v995_v58 = vmul.f32 %v1691_v29, %v976_v46  ;;  %v996_v59 = vmul.f32 %v1693_v31, %v980_v47 }
 0x2f9   :  { %v1011_v53 = vcombine.high %v1010_v49, %v1010_v49  ;;  %v1018_v54 = vrot.slane %v1010_v49, %v954_v24  ;;  %v997_v63 = vmul.f32 %v1707_v44, %v984_v51  ;;  %v998_v0 = vmul.f32 %v1709_v48, %v988_v52 }
 0x2fa   :  { %v999_v2 = vmul.f32 %v1711_v50, %v984_v51  ;;  %v1000_v4 = vmul.f32 %v1713_v55, %v988_v52 }
 0x2fb   :  { %v1025_v60 = vrot.slane %v1011_v53, %v954_v24  ;;  %v1029_v61 = vrot.slane %v1018_v54, %v1736_v20  ;;  %v1033_v62 = vrot.slane %v1018_v54, %v1740_v34 }
 0x2fd   :  { %v1037_v25 = vrot.slane %v1025_v60, %v1736_v20  ;;  %v1041_v27 = vrot.slane %v1025_v60, %v1740_v34  ;;  %v1046_v29 = vadd.f32 %v1029_v61, %v993_v56  ;;  %v1047_v5 = vadd.f32 %v1033_v62, %v994_v57 }
 0x2fe   :  { %v1048_v31 = vadd.f32 %v1029_v61, %v995_v58  ;;  %v1049_v6 = vadd.f32 %v1033_v62, %v996_v59 }
 0x2ff   :  { %v1050_v7 = vadd.f32 %v1037_v25, %v997_v63  ;;  %v1051_v8 = vadd.f32 %v1041_v27, %v998_v0  ;;  %v1052_v9 = vadd.f32 %v1037_v25, %v999_v2  ;;  %v1053_v10 = vadd.f32 %v1041_v27, %v1000_v4 }
 0x300   :  { %v1189_v13 = vmul.f32 -1.442695, %v1046_v29  ;;  %v1190_v44 = vmul.f32 -1.442695, %v1047_v5  ;;  %v1191_v15 = vmul.f32 -1.442695, %v1048_v31 }
 0x301   :  { %v1192_v48 = vmul.f32 -1.442695, %v1049_v6  ;;  %v1193_v50 = vmul.f32 -1.442695, %v1050_v7  ;;  %v1194_v55 = vmul.f32 -1.442695, %v1051_v8 }
 0x302   :  { %1330 = vpow2.f32 %v1189_v13  ;;  %v1195_v20 = vmul.f32 -1.442695, %v1052_v9  ;;  %v1196_v34 = vmul.f32 -1.442695, %v1053_v10 }
 0x303   :  { %1332 = vpow2.f32 %v1190_v44 }
 0x304   :  { %1334 = vpow2.f32 %v1191_v15 }
 0x305   :  { %1336 = vpow2.f32 %v1192_v48 }
 0x306   :  { %1338 = vpow2.f32 %v1193_v50 }
 0x307   :  { %1340 = vpow2.f32 %v1194_v55 }
 0x308   :  { %1342 = vpow2.f32 %v1195_v20 }
 0x309   :  { %1344 = vpow2.f32 %v1196_v34 }
 0x30c   :  { %v1331_v16 = vpop.eup %1330 }
 0x30d   :  { %v1333_v17 = vpop.eup %1332  ;;  %v1078_v18 = vadd.f32 1.0, %v1331_v16 }
 0x30e   :  { %v1335_v19 = vpop.eup %1334  ;;  %v1079_v21 = vadd.f32 1.0, %v1333_v17 }
 0x30f   :  { %v1337_v14 = vpop.eup %1336  ;;  %v1080_v22 = vadd.f32 1.0, %v1335_v19  ;;  %1346 = vrcp.f32 %v1078_v18 }
 0x310   :  { %v1339_v12 = vpop.eup %1338  ;;  %v1081_v24 = vadd.f32 1.0, %v1337_v14  ;;  %1348 = vrcp.f32 %v1079_v21 }
 0x311   :  { %v1341_v23 = vpop.eup %1340  ;;  %v1082_v11 = vadd.f32 1.0, %v1339_v12  ;;  %1350 = vrcp.f32 %v1080_v22 }
 0x312   :  { %v1343_v26 = vpop.eup %1342  ;;  %v1083_v28 = vadd.f32 1.0, %v1341_v23  ;;  %1352 = vrcp.f32 %v1081_v24 }
 0x313   :  { %v1345_v30 = vpop.eup %1344  ;;  %v1084_v32 = vadd.f32 1.0, %v1343_v26  ;;  %1354 = vrcp.f32 %v1082_v11 }
 0x314   :  { %v1085_v33 = vadd.f32 1.0, %v1345_v30  ;;  %1356 = vrcp.f32 %v1083_v28 }
 0x315   :  { %1358 = vrcp.f32 %v1084_v32 }
 0x316   :  { %1360 = vrcp.f32 %v1085_v33 }
 0x319   :  { %v1347_v1 = vpop.eup %1346 }
 0x31a   :  { %v1349_v35 = vpop.eup %1348  ;;  %v1102_v36 = vmul.f32 %v1347_v1, %v1046_v29 }
 0x31b   :  { %v1351_v37 = vpop.eup %1350  ;;  %v1103_v38 = vmul.f32 %v1349_v35, %v1047_v5 }
 0x31c   :  { %v1353_v39 = vpop.eup %1352  ;;  %v1104_v40 = vmul.f32 %v1351_v37, %v1048_v31  ;;  %1110 = vst [vmem:[%s1833_s9] sm:$0xff] %v1102_v36 }
 0x31d   :  { %v1355_v41 = vpop.eup %1354  ;;  %v1105_v42 = vmul.f32 %v1353_v39, %v1049_v6  ;;  %1111 = vst [vmem:[%s1833_s9 + $0x8] sm:$0xff] %v1103_v38 }
 0x31e   :  { %v1357_v3 = vpop.eup %1356  ;;  %v1106_v43 = vmul.f32 %v1355_v41, %v1050_v7  ;;  %1112 = vst [vmem:[%s1833_s9 + $0x10] sm:$0xff] %v1104_v40 }
 0x31f   :  { %v1359_v45 = vpop.eup %1358  ;;  %v1107_v46 = vmul.f32 %v1357_v3, %v1051_v8  ;;  %1113 = vst [vmem:[%s1833_s9 + $0x18] sm:$0xff] %v1105_v42 }
 0x320   :  { %v1361_v47 = vpop.eup %1360  ;;  %v1108_v49 = vmul.f32 %v1359_v45, %v1052_v9  ;;  %1114 = vst [vmem:[%s1833_s9 + $0x20] sm:$0xff] %v1106_v43 }
 0x321   :  { %v1109_v51 = vmul.f32 %v1361_v47, %v1053_v10  ;;  %1115 = vst [vmem:[%s1833_s9 + $0x28] sm:$0xff] %v1107_v46 }
 0x322   :  { %1116 = vst [vmem:[%s1833_s9 + $0x30] sm:$0xff] %v1108_v49 }
 0x323   :  { %1117 = vst [vmem:[%s1833_s9 + $0x38] sm:$0xff] %v1109_v51 }

</bundles_post_ra>
